<compile_context>
chip_gen: v5e
topology: v5e:2x2
jax: 0.10.0
libtpu: 0.0.40
codegen_flags: <defaults>
</compile_context>

<pallas_src>
import functools
from itertools import combinations

import jax
import jax.numpy as jnp
import numpy as np
from jax.experimental import pallas as pl
from jax.experimental.pallas import tpu as pltpu


def _round_up(x, m):
    return (x + m - 1) // m * m


# ----------------------------- kernels -----------------------------

def _lr_kernel(x_ref, a_ref, w_ref, b_ref, out_ref, *, out_dim, apply_sigmoid):
    """One batch tile; fused base + pairwise-interaction logistic regression.

    x_ref : (Bt, F)        input tile (batch on sublanes, features on lanes)
    a_ref : (F, O*F)       stacked symmetric zero-diagonal interaction matrices,
                           a_ref[i, o*F + j] = A_o[i, j]
    w_ref : (F + O*F, O)   fused weights: rows [0:F] = w_base.T,
                           rows [F + o*F + j, o] = 0.5 (block-sum, folds the 1/2
                           of the quadratic form)
    b_ref : (1, O)         bias
    out   : (Bt, O)        lane-exact output (no padding)
    """
    x = x_ref[...]                                                    # (Bt, F)

    # t[b, o*F + j] = sum_i x[b, i] * A_o[i, j]   (MXU)
    t = jnp.dot(x, a_ref[...], preferred_element_type=jnp.float32)   # (Bt, O*F)
    x_rep = x if out_dim == 1 else jnp.tile(x, (1, out_dim))         # (Bt, O*F)

    # Single fused MXU pass over K = F + O*F: base + 0.5 * x^T A x.
    lhs = jnp.concatenate([x, t * x_rep], axis=-1)                   # (Bt, F+O*F)
    logits = jnp.dot(lhs, w_ref[...],
                     preferred_element_type=jnp.float32) + b_ref[...]

    out_ref[...] = jax.nn.sigmoid(logits) if apply_sigmoid else logits


def _lr_kernel_linear(x_ref, w_ref, b_ref, out_ref, *, apply_sigmoid):
    """Degenerate case F < 2 (no interaction terms)."""
    logits = jnp.dot(x_ref[...], w_ref[...],
                     preferred_element_type=jnp.float32) + b_ref[...]
    out_ref[...] = jax.nn.sigmoid(logits) if apply_sigmoid else logits


# -------------------- host-side weight preprocessing --------------------

def pack_params(weight, bias):
    """One-time packing of PyTorch-layout weights into kernel operands.

    weight : (O, F + C) with C = F*(F-1)/2, bias : (O,).
    Returns a dict of jnp arrays + static dims; call once per weight set and
    reuse across forward calls (keeps the forward jit-friendly and avoids the
    O(F^2) host scatter per call).
    """
    weight = np.asarray(weight, np.float32)
    bias = np.asarray(bias, np.float32)
    O, tot = weight.shape
    # Solve F + F*(F-1)/2 == tot.
    F = int(round((-1.0 + np.sqrt(1.0 + 8.0 * tot)) / 2.0))
    C = F * (F - 1) // 2
    assert F + C == tot, (F, C, tot)

    w_base = weight[:, :F]                    # (O, F)
    w_int = weight[:, F:]                     # (O, C)

    if C > 0:
        # Symmetric, zero-diagonal interaction tensor (vectorized scatter).
        ii, jj = np.triu_indices(F, k=1)      # same order as combinations(range(F), 2)
        A = np.zeros((O, F, F), np.float32)
        A[:, ii, jj] = w_int
        A[:, jj, ii] = w_int
        a_stack = np.ascontiguousarray(
            np.transpose(A, (1, 0, 2)).reshape(F, O * F))            # (F, O*F)

        # Fused weight matrix: [w_base.T ; 0.5 * block-sum].
        s_half = np.zeros((O * F, O), np.float32)
        s_half[np.arange(O * F), np.repeat(np.arange(O), F)] = 0.5
        w_fused = np.concatenate([w_base.T, s_half], axis=0)         # (F+O*F, O)
        a_stack = jnp.asarray(a_stack)
    else:
        a_stack = None
        w_fused = np.ascontiguousarray(w_base.T)                     # (F, O)

    return dict(
        F=F, O=O, C=C,
        a_stack=a_stack,
        w_fused=jnp.asarray(w_fused),
        bias=jnp.asarray(bias.reshape(1, O)),
    )


# ----------------------------- forward -----------------------------

def logistic_regression_forward(x, params, *, return_logits=False,
                                block_b=512, backend="pallas"):
    """Forward pass matching LogisticRegressionModel.forward.

    x       : (B, F) float32
    params  : output of pack_params(weight, bias)
    backend : "pallas" | "xla" | "auto"  ("auto" uses a plain XLA fusion for
              tiny problems where custom-call launch overhead dominates)
    returns : (B, O) sigmoid probabilities (or logits if return_logits)
    """
    x = jnp.asarray(x, jnp.float32)
    B, F = x.shape
    O, C = params["O"], params["C"]
    assert F == params["F"], (F, params["F"])

    if backend == "auto":
        backend = "xla" if (B * F <= 16384 and F <= 32) else "pallas"

    if backend == "xla":
        if C > 0:
            t = x @ params["a_stack"]
            x_rep = x if O == 1 else jnp.tile(x, (1, O))
            lhs = jnp.concatenate([x, t * x_rep], axis=-1)
        else:
            lhs = x
        logits = lhs @ params["w_fused"] + params["bias"]
        return logits if return_logits else jax.nn.sigmoid(logits)

    # ---------------- batch tiling ----------------
    # Large tiles: one grid step per ~512 rows (single TC chips pay ~0.35us per
    # grid step; bigger tiles move the DMA toward the HBM roofline). On v7x an
    # even tile count >= 2 would shard across both TensorCores for huge B.
    block_b = min(block_b, _round_up(B, 8))
    B_pad = _round_up(B, block_b)
    if B_pad != B:
        x = jnp.pad(x, ((0, B_pad - B), (0, 0)))
    n_tiles = B_pad // block_b

    apply_sigmoid = not return_logits

    if C > 0:
        kernel = functools.partial(_lr_kernel, out_dim=O,
                                   apply_sigmoid=apply_sigmoid)
        operands = (x, params["a_stack"], params["w_fused"], params["bias"])
        in_specs = [
            pl.BlockSpec((block_b, F), lambda i: (i, 0)),      # x tile
            pl.BlockSpec((F, O * F), lambda i: (0, 0)),        # interaction stack
            pl.BlockSpec((F + O * F, O), lambda i: (0, 0)),    # fused weights
            pl.BlockSpec((1, O), lambda i: (0, 0)),            # bias
        ]
        flops = int(2 * B_pad * F * (O * F)      # x @ a_stack
                    + B_pad * O * F              # elementwise product
                    + 2 * B_pad * (F + O * F) * O  # fused matmul
                    + B_pad * O)                 # bias add
        w_bytes = 4 * (params["a_stack"].size + params["w_fused"].size
                       + params["bias"].size)
    else:
        kernel = functools.partial(_lr_kernel_linear,
                                   apply_sigmoid=apply_sigmoid)
        operands = (x, params["w_fused"], params["bias"])
        in_specs = [
            pl.BlockSpec((block_b, F), lambda i: (i, 0)),
            pl.BlockSpec((F, O), lambda i: (0, 0)),
            pl.BlockSpec((1, O), lambda i: (0, 0)),
        ]
        flops = int(2 * B_pad * F * O + B_pad * O)
        w_bytes = 4 * (params["w_fused"].size + params["bias"].size)

    # Constant-index weight blocks are DMA'd once, not per tile.
    cost = pl.CostEstimate(
        flops=flops,
        transcendentals=0 if return_logits else int(B_pad * O),
        bytes_accessed=int(4 * B_pad * F + 4 * B_pad * O + w_bytes))

    out = pl.pallas_call(
        kernel,
        out_shape=jax.ShapeDtypeStruct((B_pad, O), jnp.float32),
        grid=(n_tiles,),
        in_specs=in_specs,
        out_specs=pl.BlockSpec((block_b, O), lambda i: (i, 0)),
        compiler_params=pltpu.CompilerParams(
            dimension_semantics=("parallel",)),
        cost_estimate=cost,
    )(*operands)

    return out if B_pad == B else out[:B]


# ----------------------------- init / reference -----------------------------

def init_params(input_dim, output_dim, manual_init=True, seed=0):
    """Deterministic parameter init mirroring the PyTorch module's __init__.

    Returns weight (O, F + C) and bias (O,) in PyTorch nn.Linear layout.
    """
    F = input_dim
    C = F * (F - 1) // 2
    fan_in = F + C
    kw, kb = jax.random.split(jax.random.PRNGKey(seed))
    bound = 1.0 / np.sqrt(fan_in)
    weight = jax.random.uniform(kw, (output_dim, fan_in), jnp.float32,
                                minval=-bound, maxval=bound)
    bias = jax.random.uniform(kb, (output_dim,), jnp.float32,
                              minval=-bound, maxval=bound)
    if manual_init:
        row0 = jnp.concatenate(
            [jnp.ones((F,), jnp.float32), jnp.zeros((C,), jnp.float32)])
        weight = weight.at[0].set(row0)
        bias = jnp.zeros_like(bias)
    return weight, bias


def reference_forward(x, weight, bias, return_logits=False):
    """Pure-JAX reference matching the PyTorch forward semantics."""
    F = x.shape[1]
    inters = [x[:, i:i + 1] * x[:, j:j + 1]
              for i, j in combinations(range(F), 2)]
    feats = jnp.concatenate([x] + inters, axis=1) if inters else x
    logits = feats @ jnp.asarray(weight).T + jnp.asarray(bias)[None, :]
    return logits if return_logits else jax.nn.sigmoid(logits)


if __name__ == "__main__":
    # Case 1: demo-scale shapes, manual_init=True (module default), sigmoid.
    B, input_dim, output_dim = 256, 8, 1
    x = jax.random.normal(jax.random.PRNGKey(0), (B, input_dim), jnp.float32)

    weight, bias = init_params(input_dim, output_dim, manual_init=True, seed=0)
    packed = pack_params(weight, bias)
    out = jax.block_until_ready(
        logistic_regression_forward(x, packed, backend="pallas"))
    ref = reference_forward(x, weight, bias)
    np.testing.assert_allclose(np.asarray(out), np.asarray(ref),
                               rtol=1e-5, atol=1e-5)

    # Case 2: random weights (exercises the quadratic-interaction path), logits.
    weight_r, bias_r = init_params(input_dim, output_dim, manual_init=False,
                                   seed=0)
    packed_r = pack_params(weight_r, bias_r)
    logits = jax.block_until_ready(
        logistic_regression_forward(x, packed_r, return_logits=True,
                                    backend="pallas"))
    ref_logits = reference_forward(x, weight_r, bias_r, return_logits=True)
    np.testing.assert_allclose(np.asarray(logits), np.asarray(ref_logits),
                               rtol=1e-4, atol=1e-5)

    # Case 3: multi-output, batch not a multiple of 8 (exercises the tiled
    # x-repeat path and batch padding).
    B3, F3, O3 = 199, 6, 3
    x3 = jax.random.normal(jax.random.PRNGKey(1), (B3, F3), jnp.float32)
    w3, b3 = init_params(F3, O3, manual_init=False, seed=1)
    packed3 = pack_params(w3, b3)
    out3 = jax.block_until_ready(
        logistic_regression_forward(x3, packed3, backend="pallas"))
    ref3 = reference_forward(x3, w3, b3)
    np.testing.assert_allclose(np.asarray(out3), np.asarray(ref3),
                               rtol=1e-4, atol=1e-5)

    print("KERNEL_OK")
</pallas_src>

<mosaic_0001>
module attributes {stable_mosaic.version = 11 : i64} {
  func.func @_lr_kernel(%arg0: i32, %arg1: memref<256x8xf32, #tpu.memory_space<vmem>>, %arg2: memref<8x8xf32, #tpu.memory_space<vmem>>, %arg3: memref<16x1xf32, #tpu.memory_space<vmem>>, %arg4: memref<1x1xf32, #tpu.memory_space<vmem>>, %arg5: memref<256x1xf32, #tpu.memory_space<vmem>>) attributes {dimension_semantics = [#tpu.dimension_semantics<parallel>], iteration_bounds = array<i64: 1>, scalar_prefetch = 0 : i64, scratch_operands = 0 : i64, tpu.core_type = #tpu.core_type<tc>, window_params = [{transform_indices = @transform_0, window_bounds = array<i64: 256, 8>}, {pipeline_mode = #tpu.pipeline_mode<synchronous>, transform_indices = @transform_1, window_bounds = array<i64: 8, 8>}, {pipeline_mode = #tpu.pipeline_mode<synchronous>, transform_indices = @transform_2, window_bounds = array<i64: 16, 1>}, {pipeline_mode = #tpu.pipeline_mode<synchronous>, transform_indices = @transform_3, window_bounds = array<i64: 1, 1>}, {transform_indices = @transform_4, window_bounds = array<i64: 256, 1>}]} {
    %c0 = arith.constant 0 : index
    %c0_0 = arith.constant 0 : index
    %0 = vector.load %arg1[%c0, %c0_0] : memref<256x8xf32, #tpu.memory_space<vmem>>, vector<256x8xf32>
    %c0_1 = arith.constant 0 : index
    %c0_2 = arith.constant 0 : index
    %1 = vector.load %arg2[%c0_1, %c0_2] : memref<8x8xf32, #tpu.memory_space<vmem>>, vector<8x8xf32>
    %cst = arith.constant dense<0.000000e+00> : vector<256x8xf32>
    %2 = tpu.matmul %0, %1, %cst {dimension_numbers = #tpu.dot_dimension_numbers<[1], [0], [0], [1], [0, 0, 1, 1], [], []>} : vector<256x8xf32>, vector<8x8xf32>, vector<256x8xf32> -> vector<256x8xf32>
    %3 = arith.mulf %2, %0 : vector<256x8xf32>
    %4 = tpu.concatenate %0, %3 in 1 : vector<256x8xf32>, vector<256x8xf32> -> vector<256x16xf32>
    %c0_3 = arith.constant 0 : index
    %c0_4 = arith.constant 0 : index
    %5 = vector.load %arg3[%c0_3, %c0_4] : memref<16x1xf32, #tpu.memory_space<vmem>>, vector<16x1xf32>
    %cst_5 = arith.constant dense<0.000000e+00> : vector<256x1xf32>
    %6 = tpu.matmul %4, %5, %cst_5 {dimension_numbers = #tpu.dot_dimension_numbers<[1], [0], [0], [1], [0, 0, 1, 1], [], []>} : vector<256x16xf32>, vector<16x1xf32>, vector<256x1xf32> -> vector<256x1xf32>
    %c0_6 = arith.constant 0 : index
    %c0_7 = arith.constant 0 : index
    %7 = vector.load %arg4[%c0_6, %c0_7] : memref<1x1xf32, #tpu.memory_space<vmem>>, vector<1x1xf32>
    %8 = vector.broadcast %7 : vector<1x1xf32> to vector<256x1xf32>
    %9 = arith.addf %6, %8 : vector<256x1xf32>
    %10 = arith.negf %9 : vector<256x1xf32>
    %11 = math.exp %10 : vector<256x1xf32>
    %cst_8 = arith.constant 1.000000e+00 : f32
    %12 = vector.broadcast %cst_8 : f32 to vector<256x1xf32>
    %13 = arith.addf %12, %11 : vector<256x1xf32>
    %14 = arith.divf %12, %13 : vector<256x1xf32>
    %c0_9 = arith.constant 0 : index
    %c0_10 = arith.constant 0 : index
    %15 = vector.load %arg5[%c0_9, %c0_10] : memref<256x1xf32, #tpu.memory_space<vmem>>, vector<256x1xf32>
    tpu.vector_store %arg5[%c0_9, %c0_10], %14 {strides = array<i32>} : memref<256x1xf32, #tpu.memory_space<vmem>>, vector<256x1xf32>,
    return
  }
  func.func @transform_0(%arg0: i32) -> (i32, i32) {
    %c0_i32 = arith.constant 0 : i32
    %c0_i32_0 = arith.constant 0 : i32
    return %arg0, %c0_i32 : i32, i32
  }
  func.func @transform_1(%arg0: i32) -> (i32, i32) {
    %c0_i32 = arith.constant 0 : i32
    %c0_i32_0 = arith.constant 0 : i32
    %c0_i32_1 = arith.constant 0 : i32
    return %c0_i32, %c0_i32_0 : i32, i32
  }
  func.func @transform_2(%arg0: i32) -> (i32, i32) {
    %c0_i32 = arith.constant 0 : i32
    %c0_i32_0 = arith.constant 0 : i32
    %c0_i32_1 = arith.constant 0 : i32
    return %c0_i32, %c0_i32_0 : i32, i32
  }
  func.func @transform_3(%arg0: i32) -> (i32, i32) {
    %c0_i32 = arith.constant 0 : i32
    %c0_i32_0 = arith.constant 0 : i32
    %c0_i32_1 = arith.constant 0 : i32
    return %c0_i32, %c0_i32_0 : i32, i32
  }
  func.func @transform_4(%arg0: i32) -> (i32, i32) {
    %c0_i32 = arith.constant 0 : i32
    %c0_i32_0 = arith.constant 0 : i32
    return %arg0, %c0_i32 : i32, i32
  }
}

</mosaic_0001>

<bundles_post_ra>
// kernel: tpu_custom_call.1
= control target key start
LH: loop header
LB: loop body
LE: loop exit
PB: predicated region body
PF: predicated region fallthrough
CT: control target
= control target key end

     0   :  { %vm52_vm0 = vcmask 64512   ;;  %s1545_s24 = smov 8   ;;  %vm460_vm1 = vcmask 130048   ;;  %vm1278_vm3 = vcmask 7168   ;;  %s2539_s1 = inlined_call_operand.vmem [shape: f32[8,8], index: 1, kind: input, shape index: {}]   ;;  %s2540_s0 = inlined_call_operand.vmem [shape: f32[256,8], index: 0, kind: input, shape index: {}]   ;;  %s2541_s2 = inlined_call_operand.vmem [shape: f32[16,1], index: 2, kind: input, shape index: {}]   ;;  %s2542_s3 = inlined_call_operand.<no memory space> [shape: f32[1,1], index: 3, kind: input, shape index: {}]   ;;  %s2543_s4 = inlined_call_operand.vmem [shape: f32[256,1], index: 4, kind: output, shape index: {}]  }
   0x1   :  { %v51_v0 = vld [vmem:[%s2539_s1] sm:$0xff]  ;;  %v1582_v2 = vld [vmem:[%s2540_s0 + $0x88] sm:$0xff]  ;;  %v1596_v4 = vld [vmem:[%s2540_s0 + $0x90] sm:$0xff] }
   0x2   :  { %v1577_v1 = vld [vmem:[%s2540_s0] sm:$0xff]  ;;  %164 = vmatpush.msra.mxu0 %v51_v0  ;;  %1411 = vmatpush.msra.mxu3 %v51_v0  ;;  %v1591_v3 = vld [vmem:[%s2540_s0 + $0x8] sm:$0xff]  ;;  %v1605_v5 = vld [vmem:[%s2540_s0 + $0x10] sm:$0xff] }
   0x3   :  { %1315 = vmatmul.msk.f32.vlgmr.msra.gmra.mxu0 %vm52_vm0, %v1577_v1  ;;  %1332 = vmatmul.msk.f32.vlgmr.msra.gmra.mxu3 %vm52_vm0, %v1582_v2  ;;  %v1610_v6 = vld [vmem:[%s2540_s0 + $0x98] sm:$0xff]  ;;  %v1624_v8 = vld [vmem:[%s2540_s0 + $0xa0] sm:$0xff]  ;;  %v1638_v10 = vld [vmem:[%s2540_s0 + $0xa8] sm:$0xff] }
   0x4   :  { %v1619_v7 = vld [vmem:[%s2540_s0 + $0x18] sm:$0xff]  ;;  %v1633_v9 = vld [vmem:[%s2540_s0 + $0x20] sm:$0xff]  ;;  %v1647_v11 = vld [vmem:[%s2540_s0 + $0x28] sm:$0xff] }
   0x5   :  { %v1652_v12 = vld [vmem:[%s2540_s0 + $0xb0] sm:$0xff]  ;;  %v1666_v14 = vld [vmem:[%s2540_s0 + $0xb8] sm:$0xff]  ;;  %v1680_v16 = vld [vmem:[%s2540_s0 + $0xc0] sm:$0xff] }
   0x6   :  { %v1661_v13 = vld [vmem:[%s2540_s0 + $0x30] sm:$0xff]  ;;  %v1675_v15 = vld [vmem:[%s2540_s0 + $0x38] sm:$0xff]  ;;  %v1689_v17 = vld [vmem:[%s2540_s0 + $0x40] sm:$0xff] }
   0x7   :  { %v1694_v18 = vld [vmem:[%s2540_s0 + $0xc8] sm:$0xff]  ;;  %v1708_v20 = vld [vmem:[%s2540_s0 + $0xd0] sm:$0xff]  ;;  %v1722_v22 = vld [vmem:[%s2540_s0 + $0xd8] sm:$0xff] }
   0x8   :  { %v1703_v19 = vld [vmem:[%s2540_s0 + $0x48] sm:$0xff]  ;;  %v1717_v21 = vld [vmem:[%s2540_s0 + $0x50] sm:$0xff]  ;;  %v1731_v23 = vld [vmem:[%s2540_s0 + $0x58] sm:$0xff] }
   0x9   :  { %v1736_v24 = vld [vmem:[%s2540_s0 + $0xe0] sm:$0xff]  ;;  %v1750_v26 = vld [vmem:[%s2540_s0 + $0xe8] sm:$0xff]  ;;  %v1764_v28 = vld [vmem:[%s2540_s0 + $0xf0] sm:$0xff] }
   0xa   :  { %v1745_v25 = vld [vmem:[%s2540_s0 + $0x60] sm:$0xff]  ;;  %v1759_v27 = vld [vmem:[%s2540_s0 + $0x68] sm:$0xff]  ;;  %v1773_v29 = vld [vmem:[%s2540_s0 + $0x70] sm:$0xff] }
   0xb   :  { %1316 = vmatmul.msk.f32.gmra.mxu0 %vm52_vm0, %v1591_v3  ;;  %1333 = vmatmul.msk.f32.gmra.mxu3 %vm52_vm0, %v1596_v4  ;;  %v1780_v30 = vld [vmem:[%s2540_s0 + $0x78] sm:$0xff]  ;;  %v1789_v32 = vld [vmem:[%s2540_s0 + $0x80] sm:$0xff] }
  0x13   :  { %1317 = vmatmul.msk.f32.gmra.mxu0 %vm52_vm0, %v1605_v5  ;;  %1334 = vmatmul.msk.f32.gmra.mxu3 %vm52_vm0, %v1610_v6 }
  0x1b   :  { %1318 = vmatmul.msk.f32.gmra.mxu0 %vm52_vm0, %v1619_v7  ;;  %1335 = vmatmul.msk.f32.gmra.mxu3 %vm52_vm0, %v1624_v8 }
  0x23   :  { %1319 = vmatmul.msk.f32.gmra.mxu0 %vm52_vm0, %v1633_v9  ;;  %1336 = vmatmul.msk.f32.gmra.mxu3 %vm52_vm0, %v1638_v10 }
  0x2b   :  { %1320 = vmatmul.msk.f32.gmra.mxu0 %vm52_vm0, %v1647_v11  ;;  %1337 = vmatmul.msk.f32.gmra.mxu3 %vm52_vm0, %v1652_v12 }
  0x33   :  { %1321 = vmatmul.msk.f32.gmra.mxu0 %vm52_vm0, %v1661_v13  ;;  %1338 = vmatmul.msk.f32.gmra.mxu3 %vm52_vm0, %v1666_v14 }
  0x3b   :  { %1322 = vmatmul.msk.f32.gmra.mxu0 %vm52_vm0, %v1675_v15  ;;  %1339 = vmatmul.msk.f32.gmra.mxu3 %vm52_vm0, %v1680_v16 }
  0x43   :  { %1323 = vmatmul.msk.f32.gmra.mxu0 %vm52_vm0, %v1689_v17  ;;  %1340 = vmatmul.msk.f32.gmra.mxu3 %vm52_vm0, %v1694_v18 }
  0x4b   :  { %1324 = vmatmul.msk.f32.gmra.mxu0 %vm52_vm0, %v1703_v19  ;;  %1341 = vmatmul.msk.f32.gmra.mxu3 %vm52_vm0, %v1708_v20 }
  0x53   :  { %1325 = vmatmul.msk.f32.gmra.mxu0 %vm52_vm0, %v1717_v21  ;;  %1342 = vmatmul.msk.f32.gmra.mxu3 %vm52_vm0, %v1722_v22 }
  0x5b   :  { %1326 = vmatmul.msk.f32.gmra.mxu0 %vm52_vm0, %v1731_v23  ;;  %1343 = vmatmul.msk.f32.gmra.mxu3 %vm52_vm0, %v1736_v24 }
  0x63   :  { %1327 = vmatmul.msk.f32.gmra.mxu0 %vm52_vm0, %v1745_v25  ;;  %1344 = vmatmul.msk.f32.gmra.mxu3 %vm52_vm0, %v1750_v26 }
  0x6b   :  { %1328 = vmatmul.msk.f32.gmra.mxu0 %vm52_vm0, %v1759_v27  ;;  %1345 = vmatmul.msk.f32.gmra.mxu3 %vm52_vm0, %v1764_v28 }
  0x73   :  { %1329 = vmatmul.msk.f32.gmra.mxu0 %vm52_vm0, %v1773_v29 }
  0x7b   :  { %1330 = vmatmul.msk.f32.gmra.mxu0 %vm52_vm0, %v1780_v30 }
  0x80   :  { %v1784_v31 = vpop.f32.mrf.mxu0 }
  0x83   :  { %1331 = vmatmul.msk.f32.gmra.mxu0 %vm52_vm0, %v1789_v32 }
  0x86   :  { %v217_v33 = vpop.f32.mrf.mxu3 }
  0x87   :  { %v279_v34 = vmul.f32 %v217_v33, %v1582_v2 }
  0x88   :  { %v169_v35 = vpop.f32.mrf.mxu0 }
  0x89   :  { %360 = vrot.lane.b32.xlu1 %v279_v34, %s1545_s24  ;;  %v263_v37 = vmul.f32 %v169_v35, %v1591_v3  ;;  %v1826_v35 = vld [vmem:[%s2540_s0 + $0xf8] sm:$0xff] }
  0x8a   :  { %1346 = vmatmul.msk.f32.gmra.mxu3 %vm52_vm0, %v1826_v35 }
  0x8e   :  { %v220_v36 = vpop.f32.mrf.mxu3 }
  0x8f   :  { %v280_v38 = vmul.f32 %v220_v36, %v1596_v4 }
  0x90   :  { %v172_v39 = vpop.f32.mrf.mxu0 }
  0x91   :  { %362 = vrot.lane.b32.xlu2 %v280_v38, %s1545_s24  ;;  %328 = vrot.lane.b32.xlu1 %v263_v37, %s1545_s24  ;;  %v264_v41 = vmul.f32 %v172_v39, %v1605_v5 }
  0x96   :  { %v1799_v40 = vpop.f32.mrf.mxu3 }
  0x98   :  { %v175_v42 = vpop.f32.mrf.mxu0 }
  0x99   :  { %v265_v43 = vmul.f32 %v175_v42, %v1619_v7  ;;  %330 = vrot.lane.b32.xlu2 %v264_v41, %s1545_s24 }
  0x9b   :  { %332 = vrot.lane.b32.xlu1 %v265_v43, %s1545_s24 }
  0x9e   :  { %v226_v44 = vpop.f32.mrf.mxu3 }
  0x9f   :  { %v282_v45 = vmul.f32 %v226_v44, %v1624_v8 }
  0xa0   :  { %v178_v46 = vpop.f32.mrf.mxu0 }
  0xa1   :  { %366 = vrot.lane.b32.xlu2 %v282_v45, %s1545_s24 }
  0xa6   :  { %v229_v47 = vpop.f32.mrf.mxu3 }
  0xa7   :  { %v283_v48 = vmul.f32 %v229_v47, %v1638_v10 }
  0xa8   :  { %v181_v49 = vpop.f32.mrf.mxu0 }
  0xa9   :  { %v267_v50 = vmul.f32 %v181_v49, %v1647_v11  ;;  %368 = vrot.lane.b32.xlu1 %v283_v48, %s1545_s24 }
  0xab   :  { %336 = vrot.lane.b32.xlu2 %v267_v50, %s1545_s24 }
  0xae   :  { %v232_v51 = vpop.f32.mrf.mxu3 }
  0xb0   :  { %v184_v52 = vpop.f32.mrf.mxu0 }
  0xb1   :  { %v268_v53 = vmul.f32 %v184_v52, %v1661_v13 }
  0xb3   :  { %338 = vrot.lane.b32.xlu1 %v268_v53, %s1545_s24 }
  0xb6   :  { %v235_v54 = vpop.f32.mrf.mxu3 }
  0xb7   :  { %v285_v55 = vmul.f32 %v235_v54, %v1666_v14 }
  0xb8   :  { %v187_v56 = vpop.f32.mrf.mxu0 }
  0xb9   :  { %372 = vrot.lane.b32.xlu2 %v285_v55, %s1545_s24 }
  0xbe   :  { %v238_v57 = vpop.f32.mrf.mxu3 }
  0xbf   :  { %v286_v58 = vmul.f32 %v238_v57, %v1680_v16 }
  0xc0   :  { %v190_v59 = vpop.f32.mrf.mxu0 }
  0xc1   :  { %v270_v60 = vmul.f32 %v190_v59, %v1689_v17  ;;  %374 = vrot.lane.b32.xlu1 %v286_v58, %s1545_s24  ;;  %v262_v58 = vmul.f32 %v1784_v31, %v1577_v1  ;;  %v281_v59 = vmul.f32 %v1799_v40, %v1610_v6 }
  0xc3   :  { %342 = vrot.lane.b32.xlu2 %v270_v60, %s1545_s24  ;;  %v266_v60 = vmul.f32 %v178_v46, %v1633_v9 }
  0xc6   :  { %v241_v61 = vpop.f32.mrf.mxu3 }
  0xc7   :  { %v287_v31 = vmul.f32 %v241_v61, %v1694_v18  ;;  %v454_v61 = vld [vmem:[%s2541_s2] sm:$0xff] }
  0xc8   :  { %v193_v62 = vpop.f32.mrf.mxu0 }
  0xc9   :  { %v271_v63 = vmul.f32 %v193_v62, %v1703_v19  ;;  %v284_v62 = vmul.f32 %v232_v51, %v1652_v12 }
  0xcb   :  { %344 = vrot.lane.b32.xlu1 %v271_v63, %s1545_s24  ;;  %v269_v63 = vmul.f32 %v187_v56, %v1675_v15  ;;  %v455_v56 = vld [vmem:[%s2541_s2 + $0x8] sm:$0xff] }
  0xcc   :  { %1412 = vmatpush.msra.mxu2 %v455_v56  ;;  %571 = vmatpush.msra.mxu1 %v455_v56 }
  0xce   :  { %v244_v0 = vpop.f32.mrf.mxu3  ;;  %1413 = vmatpush.msra.mxu2 %v454_v61  ;;  %572 = vmatpush.msra.mxu1 %v454_v61 }
  0xcf   :  { %v288_v33 = vmul.f32 %v244_v0, %v1708_v20 }
  0xd0   :  { %v196_v34 = vpop.f32.mrf.mxu0 }
  0xd1   :  { %378 = vrot.lane.b32.xlu2 %v288_v33, %s1545_s24  ;;  %v272_v40 = vmul.f32 %v196_v34, %v1717_v21 }
  0xd6   :  { %v247_v36 = vpop.f32.mrf.mxu3 }
  0xd7   :  { %v289_v37 = vmul.f32 %v247_v36, %v1722_v22 }
  0xd8   :  { %v199_v38 = vpop.f32.mrf.mxu0 }
  0xd9   :  { %v273_v39 = vmul.f32 %v199_v38, %v1731_v23  ;;  %380 = vrot.lane.b32.xlu1 %v289_v37, %s1545_s24 }
  0xdb   :  { %348 = vrot.lane.b32.xlu2 %v273_v39, %s1545_s24 }
  0xde   :  { %v250_v41 = vpop.f32.mrf.mxu3 }
  0xdf   :  { %v290_v46 = vmul.f32 %v250_v41, %v1736_v24 }
  0xe0   :  { %v202_v42 = vpop.f32.mrf.mxu0 }
  0xe1   :  { %v274_v43 = vmul.f32 %v202_v42, %v1745_v25 }
  0xe3   :  { %350 = vrot.lane.b32.xlu1 %v274_v43, %s1545_s24 }
  0xe6   :  { %v253_v44 = vpop.f32.mrf.mxu3 }
  0xe7   :  { %v291_v45 = vmul.f32 %v253_v44, %v1750_v26 }
  0xe8   :  { %v205_v47 = vpop.f32.mrf.mxu0 }
  0xe9   :  { %384 = vrot.lane.b32.xlu2 %v291_v45, %s1545_s24  ;;  %v275_v51 = vmul.f32 %v205_v47, %v1759_v27 }
  0xeb   :  { %v363_v42 = vpop.permute.xlu2 %362 }
  0xee   :  { %v256_v48 = vpop.f32.mrf.mxu3 }
  0xef   :  { %v292_v49 = vmul.f32 %v256_v48, %v1764_v28 }
  0xf0   :  { %v208_v50 = vpop.f32.mrf.mxu0 }
  0xf1   :  { %v276_v52 = vmul.f32 %v208_v50, %v1773_v29  ;;  %386 = vrot.lane.b32.xlu1 %v292_v49, %s1545_s24 }
  0xf3   :  { %354 = vrot.lane.b32.xlu2 %v276_v52, %s1545_s24 }
  0xf8   :  { %v211_v53 = vpop.f32.mrf.mxu0 }
  0xf9   :  { %v277_v54 = vmul.f32 %v211_v53, %v1780_v30 }
  0xfb   :  { %356 = vrot.lane.b32.xlu1 %v277_v54, %s1545_s24  ;;  %v361_v37 = vpop.permute.xlu1 %360 }
  0xfc   :  { %v439_v38 = vsel %vm52_vm0, %v1582_v2, %v361_v37  ;;  %v331_v2 = vpop.permute.xlu2 %330 }
  0xfd   :  { %v424_v47 = vsel %vm52_vm0, %v1605_v5, %v331_v2 }
 0x100   :  { %v214_v55 = vpop.f32.mrf.mxu0 }
 0x101   :  { %v278_v57 = vmul.f32 %v214_v55, %v1789_v32 }
 0x103   :  { %358 = vrot.lane.b32.xlu0 %v278_v57, %s1545_s24  ;;  %v329_v43 = vpop.permute.xlu1 %328 }
 0x104   :  { %v423_v44 = vsel %vm52_vm0, %v1591_v3, %v329_v43  ;;  %v367_v48 = vpop.permute.xlu2 %366 }
 0x105   :  { %v442_v49 = vsel %vm52_vm0, %v1624_v8, %v367_v48 }
 0x10b   :  { %326 = vrot.lane.b32.xlu0 %v262_v58, %s1545_s24 }
 0x10d   :  { %v259_v0 = vpop.f32.mrf.mxu3  ;;  %v333_v3 = vpop.permute.xlu1 %332 }
 0x10e   :  { %v293_v33 = vmul.f32 %v259_v0, %v1826_v35 }
 0x113   :  { %364 = vrot.lane.b32.xlu0 %v281_v59, %s1545_s24 }
 0x11b   :  { %334 = vrot.lane.b32.xlu0 %v266_v60, %s1545_s24  ;;  %v369_v50 = vpop.permute.xlu1 %368 }
 0x11c   :  { %v443_v5 = vsel %vm52_vm0, %v1638_v10, %v369_v50 }
 0x123   :  { %370 = vrot.lane.b32.xlu0 %v284_v62, %s1545_s24 }
 0x125   :  { %v339_v10 = vpop.permute.xlu1 %338 }
 0x12b   :  { %340 = vrot.lane.b32.xlu0 %v269_v63, %s1545_s24 }
 0x133   :  { %376 = vrot.lane.b32.xlu0 %v287_v31, %s1545_s24  ;;  %v375_v58 = vpop.permute.xlu1 %374 }
 0x13b   :  { %346 = vrot.lane.b32.xlu0 %v272_v40, %s1545_s24 }
 0x143   :  { %382 = vrot.lane.b32.xlu0 %v290_v46, %s1545_s24 }
 0x14b   :  { %352 = vrot.lane.b32.xlu0 %v275_v51, %s1545_s24 }
 0x153   :  { %388 = vrot.lane.b32.xlu0 %v293_v33, %s1545_s24 }
 0x175   :  { %v359_v34 = vpop.permute.xlu0 %358 }
 0x176   :  { %v438_v36 = vsel %vm52_vm0, %v1789_v32, %v359_v34  ;;  %v440_v32 = vsel %vm52_vm0, %v1596_v4, %v363_v42  ;;  %v425_v4 = vsel %vm52_vm0, %v1619_v7, %v333_v3  ;;  %v337_v7 = vpop.permute.xlu2 %336 }
 0x177   :  { %1363 = vmatmul.msk.f32.vlgmr.msra.gmra.mxu2 %vm460_vm1, %v438_v36  ;;  %v427_v54 = vsel %vm52_vm0, %v1647_v11, %v337_v7  ;;  %v446_v11 = vsel %vm52_vm0, %v1680_v16, %v375_v58  ;;  %v345_v16 = vpop.permute.xlu1 %344 }
 0x17d   :  { %v327_v39 = vpop.permute.xlu0 %326 }
 0x17e   :  { %v422_v41 = vsel %vm52_vm0, %v1577_v1, %v327_v39  ;;  %v373_v55 = vpop.permute.xlu2 %372 }
 0x17f   :  { %1347 = vmatmul.msk.f32.vlgmr.msra.gmra.mxu1 %vm460_vm1, %v422_v41  ;;  %1364 = vmatmul.msk.f32.gmra.mxu2 %vm460_vm1, %v439_v38  ;;  %v445_v57 = vsel %vm52_vm0, %v1666_v14, %v373_v55  ;;  %v381_v40 = vpop.permute.xlu1 %380 }
 0x185   :  { %v365_v45 = vpop.permute.xlu0 %364 }
 0x186   :  { %v441_v1 = vsel %vm52_vm0, %v1610_v6, %v365_v45 }
 0x187   :  { %1348 = vmatmul.msk.f32.gmra.mxu1 %vm460_vm1, %v423_v44  ;;  %1365 = vmatmul.msk.f32.gmra.mxu2 %vm460_vm1, %v440_v32 }
 0x18d   :  { %v335_v6 = vpop.permute.xlu0 %334 }
 0x18e   :  { %v426_v52 = vsel %vm52_vm0, %v1633_v9, %v335_v6  ;;  %v428_v9 = vsel %vm52_vm0, %v1661_v13, %v339_v10  ;;  %v343_v13 = vpop.permute.xlu2 %342 }
 0x18f   :  { %1349 = vmatmul.msk.f32.gmra.mxu1 %vm460_vm1, %v424_v47  ;;  %1366 = vmatmul.msk.f32.gmra.mxu2 %vm460_vm1, %v441_v1  ;;  %v430_v62 = vsel %vm52_vm0, %v1689_v17, %v343_v13  ;;  %v449_v17 = vsel %vm52_vm0, %v1722_v22, %v381_v40 }
 0x195   :  { %v371_v53 = vpop.permute.xlu0 %370 }
 0x196   :  { %v444_v8 = vsel %vm52_vm0, %v1652_v12, %v371_v53  ;;  %v379_v63 = vpop.permute.xlu2 %378 }
 0x197   :  { %1350 = vmatmul.msk.f32.gmra.mxu1 %vm460_vm1, %v425_v4  ;;  %1367 = vmatmul.msk.f32.gmra.mxu2 %vm460_vm1, %v442_v49  ;;  %v448_v31 = vsel %vm52_vm0, %v1708_v20, %v379_v63 }
 0x19d   :  { %v341_v12 = vpop.permute.xlu0 %340 }
 0x19e   :  { %v429_v59 = vsel %vm52_vm0, %v1675_v15, %v341_v12  ;;  %v431_v15 = vsel %vm52_vm0, %v1703_v19, %v345_v16  ;;  %v9_v19 = vstv %s2542_s3  ;;  %v349_v20 = vpop.permute.xlu2 %348 }
 0x19f   :  { %1351 = vmatmul.msk.f32.gmra.mxu1 %vm460_vm1, %v426_v52  ;;  %1368 = vmatmul.msk.f32.gmra.mxu2 %vm460_vm1, %v443_v5  ;;  %10 = vst [vmem:[#allocation2] sm:$0x1] %v9_v19  ;;  %v433_v22 = vsel %vm52_vm0, %v1731_v23, %v349_v20 }
 0x1a5   :  { %v377_v60 = vpop.permute.xlu0 %376 }
 0x1a6   :  { %v447_v14 = vsel %vm52_vm0, %v1694_v18, %v377_v60  ;;  %v385_v61 = vpop.permute.xlu2 %384  ;;  %v1973_v39 = vld [vmem:[#allocation2] ss:$0 sm:$0xff] }
 0x1a7   :  { %1352 = vmatmul.msk.f32.gmra.mxu1 %vm460_vm1, %v427_v54  ;;  %1369 = vmatmul.msk.f32.gmra.mxu2 %vm460_vm1, %v444_v8  ;;  %v451_v33 = vsel %vm52_vm0, %v1750_v26, %v385_v61 }
 0x1ad   :  { %v347_v18 = vpop.permute.xlu0 %346 }
 0x1ae   :  { %v432_v46 = vsel %vm52_vm0, %v1717_v21, %v347_v18  ;;  %v351_v21 = vpop.permute.xlu1 %350  ;;  %v355_v37 = vpop.permute.xlu2 %354 }
 0x1af   :  { %1353 = vmatmul.msk.f32.gmra.mxu1 %vm460_vm1, %v428_v9  ;;  %1370 = vmatmul.msk.f32.gmra.mxu2 %vm460_vm1, %v445_v57  ;;  %v434_v0 = vsel %vm52_vm0, %v1745_v25, %v351_v21  ;;  %v436_v38 = vsel %vm52_vm0, %v1773_v29, %v355_v37 }
 0x1b5   :  { %v383_v51 = vpop.permute.xlu0 %382 }
 0x1b6   :  { %v450_v56 = vsel %vm52_vm0, %v1736_v24, %v383_v51  ;;  %v387_v34 = vpop.permute.xlu1 %386 }
 0x1b7   :  { %1354 = vmatmul.msk.f32.gmra.mxu1 %vm460_vm1, %v429_v59  ;;  %1371 = vmatmul.msk.f32.gmra.mxu2 %vm460_vm1, %v446_v11  ;;  %v452_v23 = vsel %vm52_vm0, %v1764_v28, %v387_v34 }
 0x1bd   :  { %v353_v24 = vpop.permute.xlu0 %352 }
 0x1be   :  { %v435_v36 = vsel %vm52_vm0, %v1759_v27, %v353_v24  ;;  %v357_v28 = vpop.permute.xlu1 %356 }
 0x1bf   :  { %1355 = vmatmul.msk.f32.gmra.mxu1 %vm460_vm1, %v430_v62  ;;  %1372 = vmatmul.msk.f32.gmra.mxu2 %vm460_vm1, %v447_v14  ;;  %v437_v27 = vsel %vm52_vm0, %v1780_v30, %v357_v28 }
 0x1c5   :  { %v389_v25 = vpop.permute.xlu0 %388 }
 0x1c6   :  { %v453_v26 = vsel %vm52_vm0, %v1826_v35, %v389_v25 }
 0x1c7   :  { %1356 = vmatmul.msk.f32.gmra.mxu1 %vm460_vm1, %v431_v15  ;;  %1373 = vmatmul.msk.f32.gmra.mxu2 %vm460_vm1, %v448_v31 }
 0x1cf   :  { %1357 = vmatmul.msk.f32.gmra.mxu1 %vm460_vm1, %v432_v46  ;;  %1374 = vmatmul.msk.f32.gmra.mxu2 %vm460_vm1, %v449_v17 }
 0x1d7   :  { %1358 = vmatmul.msk.f32.gmra.mxu1 %vm460_vm1, %v433_v22  ;;  %1375 = vmatmul.msk.f32.gmra.mxu2 %vm460_vm1, %v450_v56 }
 0x1df   :  { %1359 = vmatmul.msk.f32.gmra.mxu1 %vm460_vm1, %v434_v0  ;;  %1376 = vmatmul.msk.f32.gmra.mxu2 %vm460_vm1, %v451_v33 }
 0x1e7   :  { %1360 = vmatmul.msk.f32.gmra.mxu1 %vm460_vm1, %v435_v36  ;;  %1377 = vmatmul.msk.f32.gmra.mxu2 %vm460_vm1, %v452_v23 }
 0x1ef   :  { %1361 = vmatmul.msk.f32.gmra.mxu1 %vm460_vm1, %v436_v38  ;;  %1378 = vmatmul.msk.f32.gmra.mxu2 %vm460_vm1, %v453_v26 }
 0x1f7   :  { %1362 = vmatmul.msk.f32.gmra.mxu1 %vm460_vm1, %v437_v27 }
 0x1fa   :  { %v622_v41 = vpop.f32.mrf.mxu2 }
 0x1fb   :  { %v623_v42 = vadd.f32 %v1973_v39, %v622_v41 }
 0x1fc   :  { %v574_v43 = vpop.f32.mrf.mxu1 }
 0x1fd   :  { %v1395_v35 = vmul.f32 -1.442695, %v623_v42  ;;  %v575_v44 = vadd.f32 %v1973_v39, %v574_v43 }
 0x1ff   :  { %1416 = vpow2.f32 %v1395_v35  ;;  %v1379_v29 = vmul.f32 -1.442695, %v575_v44 }
 0x201   :  { %1418 = vpow2.f32 %v1379_v29 }
 0x202   :  { %v625_v32 = vpop.f32.mrf.mxu2 }
 0x203   :  { %v626_v2 = vadd.f32 %v1973_v39, %v625_v32 }
 0x204   :  { %v577_v45 = vpop.f32.mrf.mxu1 }
 0x205   :  { %v1417_v1 = vpop.eup %1416  ;;  %v1396_v30 = vmul.f32 -1.442695, %v626_v2  ;;  %v578_v47 = vadd.f32 %v1973_v39, %v577_v45 }
 0x206   :  { %v782_v3 = vadd.f32 1.0, %v1417_v1 }
 0x207   :  { %v1419_v48 = vpop.eup %1418  ;;  %1420 = vpow2.f32 %v1396_v30  ;;  %v1380_v4 = vmul.f32 -1.442695, %v578_v47 }
 0x208   :  { %1422 = vrcp.f32 %v782_v3  ;;  %v1979_v49 = vadd.f32 1.0, %v1419_v48  ;;  %v1047_v9 = vand.u32 2147483647, %v782_v3  ;;  %v1049_v57 = vand.u32 2147483648, %v782_v3 }
 0x209   :  { %1424 = vpow2.f32 %v1380_v4  ;;  %vm1043_vm2 = vweird.f32 %v782_v3 }
 0x20a   :  { %v628_v6 = vpop.f32.mrf.mxu2  ;;  %1426 = vrcp.f32 %v1979_v49  ;;  %vm1990_vm5 = vcmp.eq.f32.partialorder %v1047_v9, 8.507059e+37  ;;  %v1050_v16 = vor.u32 1.1754944e-38, %v1049_v57  ;;  %vm803_vm6 = vweird.f32 %v1979_v49 }
 0x20b   :  { %v629_v50 = vadd.f32 %v1973_v39, %v628_v6  ;;  %v809_v40 = vand.u32 2147483648, %v1979_v49  ;;  %v807_v20 = vand.u32 2147483647, %v1979_v49 }
 0x20c   :  { %v580_v5 = vpop.f32.mrf.mxu1 }
 0x20d   :  { %v1421_v52 = vpop.eup %1420  ;;  %v581_v7 = vadd.f32 %v1973_v39, %v580_v5  ;;  %v1397_v54 = vmul.f32 -1.442695, %v629_v50  ;;  %v810_v36 = vor.u32 1.1754944e-38, %v809_v40  ;;  %vm808_vm10 = vcmp.eq.f32.partialorder %v807_v20, 8.507059e+37 }
 0x20e   :  { %v1423_v53 = vpop.eup %1422  ;;  %v1984_v8 = vadd.f32 1.0, %v1421_v52 }
 0x20f   :  { %v1425_v10 = vpop.eup %1424  ;;  %v1039_v55 = vmul.f32 %v1423_v53, %v782_v3  ;;  %v1381_v12 = vmul.f32 -1.442695, %v581_v7  ;;  %vm1044_vm4 = vweird.f32 %v1423_v53 }
 0x210   :  { %1428 = vrcp.f32 %v1984_v8  ;;  %v1427_v58 = vpop.eup %1426  ;;  %v1987_v59 = vadd.f32 1.0, %v1425_v10  ;;  %vm1045_vm7 = vmor %vm1043_vm2, %vm1044_vm4  ;;  %v1062_v61 = vand.u32 2147483647, %v1984_v8  ;;  %v1064_v37 = vand.u32 2147483648, %v1984_v8 }
 0x211   :  { %v1040_v11 = vsub.f32 1.0, %v1039_v55  ;;  %1430 = vpow2.f32 %v1397_v54  ;;  %v799_v13 = vmul.f32 %v1427_v58, %v1979_v49  ;;  %vm804_vm8 = vweird.f32 %v1427_v58 }
 0x212   :  { %v631_v60 = vpop.f32.mrf.mxu2  ;;  %1432 = vrcp.f32 %v1987_v59  ;;  %vm805_vm9 = vmor %vm803_vm6, %vm804_vm8  ;;  %v822_v43 = vand.u32 2147483647, %v1987_v59  ;;  %vm1058_vm12 = vweird.f32 %v1984_v8  ;;  %vm2022_vm13 = vcmp.eq.f32.partialorder %v1062_v61, 8.507059e+37 }
 0x213   :  { %v1041_v14 = vmul.f32 %v1423_v53, %v1040_v11  ;;  %v800_v63 = vsub.f32 1.0, %v799_v13  ;;  %1434 = vpow2.f32 %v1381_v12  ;;  %v632_v15 = vadd.f32 %v1973_v39, %v631_v60 }
 0x214   :  { %v583_v31 = vpop.f32.mrf.mxu1  ;;  %v1065_v45 = vor.u32 1.1754944e-38, %v1064_v37  ;;  %vm818_vm14 = vweird.f32 %v1987_v59  ;;  %v824_v1 = vand.u32 2147483648, %v1987_v59  ;;  %vm2032_vm1 = vcmp.eq.f32.partialorder %v822_v43, 8.507059e+37 }
 0x215   :  { %v1042_v18 = vadd.f32 %v1423_v53, %v1041_v14  ;;  %v584_v17 = vadd.f32 %v1973_v39, %v583_v31  ;;  %v801_v19 = vmul.f32 %v1427_v58, %v800_v63  ;;  %v1398_v51 = vmul.f32 -1.442695, %v632_v15 }
 0x216   :  { %v1429_v46 = vpop.eup %1428  ;;  %v825_v54 = vor.u32 1.1754944e-38, %v824_v1 }
 0x217   :  { %v1431_v56 = vpop.eup %1430  ;;  %v1046_v22 = vsel %vm1045_vm7, %v1423_v53, %v1042_v18  ;;  %v1054_v21 = vmul.f32 %v1429_v46, %v1984_v8  ;;  %v1382_v0 = vmul.f32 -1.442695, %v584_v17  ;;  %v802_v24 = vadd.f32 %v1427_v58, %v801_v19 }
 0x218   :  { %v1051_v33 = vsel %vm1990_vm5, %v1050_v16, %v1046_v22  ;;  %v2005_v34 = vadd.f32 1.0, %v1431_v56  ;;  %1436 = vpow2.f32 %v1398_v51  ;;  %v1433_v23 = vpop.eup %1432  ;;  %vm1059_vm11 = vweird.f32 %v1429_v46 }
 0x219   :  { %1295 = vst.msk [vmem:[%s2543_s4 + $0x80] sm:$0xff] %vm1278_vm3, %v1051_v33  ;;  %v1055_v25 = vsub.f32 1.0, %v1054_v21  ;;  %1438 = vpow2.f32 %v1382_v0  ;;  %v1435_v26 = vpop.eup %1434  ;;  %v806_v38 = vsel %vm805_vm9, %v1427_v58, %v802_v24  ;;  %v814_v28 = vmul.f32 %v1433_v23, %v1987_v59  ;;  %vm1060_vm15 = vmor %vm1058_vm12, %vm1059_vm11 }
 0x21a   :  { %1440 = vrcp.f32 %v2005_v34  ;;  %v634_v27 = vpop.f32.mrf.mxu2  ;;  %v811_v41 = vsel %vm808_vm10, %v810_v36, %v806_v38  ;;  %v2026_v29 = vadd.f32 1.0, %v1435_v26  ;;  %vm819_vm0 = vweird.f32 %v1433_v23 }
 0x21b   :  { %v1056_v42 = vmul.f32 %v1429_v46, %v1055_v25  ;;  %1279 = vst.msk [vmem:[%s2543_s4] sm:$0xff] %vm1278_vm3, %v811_v41  ;;  %v815_v44 = vsub.f32 1.0, %v814_v28  ;;  %v635_v3 = vadd.f32 %v1973_v39, %v634_v27  ;;  %v1077_v6 = vand.u32 2147483647, %v2005_v34  ;;  %vm820_vm2 = vmor %vm818_vm14, %vm819_vm0 }
 0x21c   :  { %v586_v32 = vpop.f32.mrf.mxu1  ;;  %1442 = vrcp.f32 %v2026_v29  ;;  %v1079_v53 = vand.u32 2147483648, %v2005_v34  ;;  %v837_v55 = vand.u32 2147483647, %v2026_v29  ;;  %v839_v12 = vand.u32 2147483648, %v2026_v29 }
 0x21d   :  { %v1057_v2 = vadd.f32 %v1429_v46, %v1056_v42  ;;  %v816_v47 = vmul.f32 %v1433_v23, %v815_v44  ;;  %v587_v9 = vadd.f32 %v1973_v39, %v586_v32  ;;  %v1399_v58 = vmul.f32 -1.442695, %v635_v3 }
 0x21e   :  { %v1437_v30 = vpop.eup %1436  ;;  %vm1073_vm4 = vweird.f32 %v2005_v34  ;;  %vm2063_vm5 = vcmp.eq.f32.partialorder %v1077_v6, 8.507059e+37  ;;  %v1080_v62 = vor.u32 1.1754944e-38, %v1079_v53  ;;  %vm833_vm7 = vweird.f32 %v2026_v29 }
 0x21f   :  { %v1439_v48 = vpop.eup %1438  ;;  %v1061_v4 = vsel %vm1060_vm15, %v1429_v46, %v1057_v2  ;;  %v2037_v50 = vadd.f32 1.0, %v1437_v30  ;;  %v817_v7 = vadd.f32 %v1433_v23, %v816_v47  ;;  %vm2069_vm8 = vcmp.eq.f32.partialorder %v837_v55, 8.507059e+37 }
 0x220   :  { %v1441_v5 = vpop.eup %1440  ;;  %v1066_v52 = vsel %vm2022_vm13, %v1065_v45, %v1061_v4  ;;  %v2042_v8 = vadd.f32 1.0, %v1439_v48  ;;  %v840_v18 = vor.u32 1.1754944e-38, %v839_v12  ;;  %v1383_v40 = vmul.f32 -1.442695, %v587_v9 }
 0x221   :  { %1296 = vst.msk [vmem:[%s2543_s4 + $0x88] sm:$0xff] %vm1278_vm3, %v1066_v52  ;;  %v1069_v10 = vmul.f32 %v1441_v5, %v2005_v34  ;;  %v821_v57 = vsel %vm820_vm2, %v1433_v23, %v817_v7  ;;  %1444 = vrcp.f32 %v2037_v50  ;;  %vm1074_vm6 = vweird.f32 %v1441_v5 }
 0x222   :  { %v637_v11 = vpop.f32.mrf.mxu2  ;;  %v826_v13 = vsel %vm2032_vm1, %v825_v54, %v821_v57  ;;  %1446 = vrcp.f32 %v2042_v8  ;;  %v1443_v59 = vpop.eup %1442  ;;  %vm1088_vm9 = vweird.f32 %v2037_v50  ;;  %vm1075_vm10 = vmor %vm1073_vm4, %vm1074_vm6  ;;  %v1092_v56 = vand.u32 2147483647, %v2037_v50 }
 0x223   :  { %v1070_v60 = vsub.f32 1.0, %v1069_v10  ;;  %1280 = vst.msk [vmem:[%s2543_s4 + $0x8] sm:$0xff] %vm1278_vm3, %v826_v13  ;;  %v829_v15 = vmul.f32 %v1443_v59, %v2026_v29  ;;  %1448 = vpow2.f32 %v1399_v58  ;;  %v638_v19 = vadd.f32 %v1973_v39, %v637_v11 }
 0x224   :  { %v589_v16 = vpop.f32.mrf.mxu1  ;;  %v1094_v22 = vand.u32 2147483648, %v2037_v50  ;;  %v852_v21 = vand.u32 2147483647, %v2042_v8  ;;  %1450 = vpow2.f32 %v1383_v40  ;;  %vm834_vm11 = vweird.f32 %v1443_v59 }
 0x225   :  { %v1071_v63 = vmul.f32 %v1441_v5, %v1070_v60  ;;  %v830_v46 = vsub.f32 1.0, %v829_v15  ;;  %v590_v20 = vadd.f32 %v1973_v39, %v589_v16  ;;  %v854_v34 = vand.u32 2147483648, %v2042_v8  ;;  %vm835_vm12 = vmor %vm833_vm7, %vm834_vm11 }
 0x226   :  { %v1400_v25 = vmul.f32 -1.442695, %v638_v19  ;;  %vm1093_vm15 = vcmp.eq.f32.partialorder %v1092_v56, 8.507059e+37  ;;  %vm848_vm0 = vweird.f32 %v2042_v8  ;;  %v1095_v3 = vor.u32 1.1754944e-38, %v1094_v22 }
 0x227   :  { %v1072_v17 = vadd.f32 %v1441_v5, %v1071_v63  ;;  %v1445_v51 = vpop.eup %1444  ;;  %v831_v33 = vmul.f32 %v1443_v59, %v830_v46  ;;  %v1384_v28 = vmul.f32 -1.442695, %v590_v20  ;;  %vm853_vm4 = vcmp.eq.f32.partialorder %v852_v21, 8.507059e+37 }
 0x228   :  { %v1447_v61 = vpop.eup %1446  ;;  %v1084_v24 = vmul.f32 %v1445_v51, %v2037_v50  ;;  %vm1089_vm13 = vweird.f32 %v1445_v51  ;;  %1452 = vpow2.f32 %v1400_v25  ;;  %v855_v6 = vor.u32 1.1754944e-38, %v854_v34 }
 0x229   :  { %v1076_v0 = vsel %vm1075_vm10, %v1441_v5, %v1072_v17  ;;  %v844_v36 = vmul.f32 %v1447_v61, %v2042_v8  ;;  %v832_v26 = vadd.f32 %v1443_v59, %v831_v33  ;;  %v1449_v41 = vpop.eup %1448  ;;  %vm849_vm14 = vweird.f32 %v1447_v61  ;;  %vm1090_vm1 = vmor %vm1088_vm9, %vm1089_vm13 }
 0x22a   :  { %v1081_v23 = vsel %vm2063_vm5, %v1080_v62, %v1076_v0  ;;  %v640_v37 = vpop.f32.mrf.mxu2  ;;  %v1085_v38 = vsub.f32 1.0, %v1084_v24  ;;  %v2093_v32 = vadd.f32 1.0, %v1449_v41  ;;  %1454 = vpow2.f32 %v1384_v28  ;;  %v1451_v2 = vpop.eup %1450  ;;  %vm850_vm2 = vmor %vm848_vm0, %vm849_vm14 }
 0x22b   :  { %1297 = vst.msk [vmem:[%s2543_s4 + $0x90] sm:$0xff] %vm1278_vm3, %v1081_v23  ;;  %v641_v27 = vadd.f32 %v1973_v39, %v640_v37  ;;  %v845_v42 = vsub.f32 1.0, %v844_v36  ;;  %v836_v35 = vsel %vm835_vm12, %v1443_v59, %v832_v26  ;;  %v2107_v4 = vadd.f32 1.0, %v1451_v2 }
 0x22c   :  { %v592_v43 = vpop.f32.mrf.mxu1  ;;  %v1086_v44 = vmul.f32 %v1445_v51, %v1085_v38  ;;  %v841_v45 = vsel %vm2069_vm8, %v840_v18, %v836_v35  ;;  %1456 = vrcp.f32 %v2093_v32  ;;  %v1107_v8 = vand.u32 2147483647, %v2093_v32 }
 0x22d   :  { %v846_v1 = vmul.f32 %v1447_v61, %v845_v42  ;;  %v1401_v30 = vmul.f32 -1.442695, %v641_v27  ;;  %v593_v47 = vadd.f32 %v1973_v39, %v592_v43  ;;  %1281 = vst.msk [vmem:[%s2543_s4 + $0x10] sm:$0xff] %vm1278_vm3, %v841_v45  ;;  %v1109_v55 = vand.u32 2147483648, %v2093_v32 }
 0x22e   :  { %v1087_v29 = vadd.f32 %v1445_v51, %v1086_v44  ;;  %v1453_v52 = vpop.eup %1452  ;;  %v867_v11 = vand.u32 2147483647, %v2107_v4  ;;  %vm1103_vm5 = vweird.f32 %v2093_v32  ;;  %vm2128_vm6 = vcmp.eq.f32.partialorder %v1107_v8, 8.507059e+37 }
 0x22f   :  { %v847_v48 = vadd.f32 %v1447_v61, %v846_v1  ;;  %1458 = vpow2.f32 %v1401_v30  ;;  %v1385_v5 = vmul.f32 -1.442695, %v593_v47  ;;  %v2121_v9 = vadd.f32 1.0, %v1453_v52 }
 0x230   :  { %v1091_v49 = vsel %vm1090_vm1, %v1445_v51, %v1087_v29  ;;  %1460 = vrcp.f32 %v2107_v4  ;;  %v1455_v54 = vpop.eup %1454  ;;  %v1110_v14 = vor.u32 1.1754944e-38, %v1109_v55  ;;  %vm863_vm7 = vweird.f32 %v2107_v4 }
 0x231   :  { %v1096_v7 = vsel %vm1093_vm15, %v1095_v3, %v1091_v49  ;;  %v851_v53 = vsel %vm850_vm2, %v1447_v61, %v847_v48  ;;  %v2123_v57 = vadd.f32 1.0, %v1455_v54  ;;  %1462 = vpow2.f32 %v1385_v5 }
 0x232   :  { %v643_v50 = vpop.f32.mrf.mxu2  ;;  %1298 = vst.msk [vmem:[%s2543_s4 + $0x98] sm:$0xff] %vm1278_vm3, %v1096_v7  ;;  %v856_v10 = vsel %vm853_vm4, %v855_v6, %v851_v53  ;;  %v1457_v58 = vpop.eup %1456  ;;  %1464 = vrcp.f32 %v2121_v9  ;;  %v869_v62 = vand.u32 2147483648, %v2107_v4  ;;  %v1124_v15 = vand.u32 2147483648, %v2121_v9 }
 0x233   :  { %1282 = vst.msk [vmem:[%s2543_s4 + $0x18] sm:$0xff] %vm1278_vm3, %v856_v10  ;;  %v1099_v60 = vmul.f32 %v1457_v58, %v2093_v32  ;;  %1466 = vrcp.f32 %v2123_v57  ;;  %v644_v18 = vadd.f32 %v1973_v39, %v643_v50  ;;  %vm2141_vm8 = vcmp.eq.f32.partialorder %v867_v11, 8.507059e+37 }
 0x234   :  { %v595_v12 = vpop.f32.mrf.mxu1  ;;  %v1122_v46 = vand.u32 2147483647, %v2121_v9  ;;  %v884_v19 = vand.u32 2147483648, %v2123_v57  ;;  %vm1104_vm9 = vweird.f32 %v1457_v58  ;;  %v882_v56 = vand.u32 2147483647, %v2123_v57 }
 0x235   :  { %v1459_v13 = vpop.eup %1458  ;;  %v1100_v63 = vsub.f32 1.0, %v1099_v60  ;;  %v870_v61 = vor.u32 1.1754944e-38, %v869_v62  ;;  %vm1118_vm10 = vweird.f32 %v2121_v9  ;;  %v596_v0 = vadd.f32 %v1973_v39, %v595_v12  ;;  %vm1105_vm13 = vmor %vm1103_vm5, %vm1104_vm9 }
 0x236   :  { %v1461_v16 = vpop.eup %1460  ;;  %v2137_v31 = vadd.f32 1.0, %v1459_v13  ;;  %v1125_v23 = vor.u32 1.1754944e-38, %v1124_v15  ;;  %vm878_vm12 = vweird.f32 %v2123_v57  ;;  %vm2158_vm14 = vcmp.eq.f32.partialorder %v1122_v46, 8.507059e+37 }
 0x237   :  { %v859_v40 = vmul.f32 %v1461_v16, %v2107_v4  ;;  %v1463_v20 = vpop.eup %1462  ;;  %v1101_v51 = vmul.f32 %v1457_v58, %v1100_v63  ;;  %vm864_vm11 = vweird.f32 %v1461_v16  ;;  %v885_v28 = vor.u32 1.1754944e-38, %v884_v19 }
 0x238   :  { %1468 = vrcp.f32 %v2137_v31  ;;  %v1465_v33 = vpop.eup %1464  ;;  %v2152_v36 = vadd.f32 1.0, %v1463_v20  ;;  %v1137_v27 = vand.u32 2147483647, %v2137_v31  ;;  %vm2164_vm15 = vcmp.eq.f32.partialorder %v882_v56, 8.507059e+37  ;;  %vm865_vm0 = vmor %vm863_vm7, %vm864_vm11 }
 0x239   :  { %v860_v21 = vsub.f32 1.0, %v859_v40  ;;  %v1102_v24 = vadd.f32 %v1457_v58, %v1101_v51  ;;  %v1467_v25 = vpop.eup %1466  ;;  %v1114_v26 = vmul.f32 %v1465_v33, %v2121_v9  ;;  %v1139_v35 = vand.u32 2147483648, %v2137_v31 }
 0x23a   :  { %v646_v22 = vpop.f32.mrf.mxu2  ;;  %v874_v42 = vmul.f32 %v1467_v25, %v2123_v57  ;;  %v1402_v44 = vmul.f32 -1.442695, %v644_v18  ;;  %1470 = vrcp.f32 %v2152_v36  ;;  %vm1119_vm1 = vweird.f32 %v1465_v33 }
 0x23b   :  { %v861_v37 = vmul.f32 %v1461_v16, %v860_v21  ;;  %v1106_v41 = vsel %vm1105_vm13, %v1457_v58, %v1102_v24  ;;  %v1115_v45 = vsub.f32 1.0, %v1114_v26  ;;  %vm1133_vm2 = vweird.f32 %v2137_v31  ;;  %vm1120_vm7 = vmor %vm1118_vm10, %vm1119_vm1 }
 0x23c   :  { %v598_v34 = vpop.f32.mrf.mxu1  ;;  %v1111_v32 = vsel %vm2128_vm6, %v1110_v14, %v1106_v41  ;;  %v875_v30 = vsub.f32 1.0, %v874_v42  ;;  %v1386_v47 = vmul.f32 -1.442695, %v596_v0  ;;  %vm879_vm4 = vweird.f32 %v1467_v25 }
 0x23d   :  { %v862_v2 = vadd.f32 %v1461_v16, %v861_v37  ;;  %1299 = vst.msk [vmem:[%s2543_s4 + $0xa0] sm:$0xff] %vm1278_vm3, %v1111_v32  ;;  %v1116_v3 = vmul.f32 %v1465_v33, %v1115_v45  ;;  %vm2181_vm5 = vcmp.eq.f32.partialorder %v1137_v27, 8.507059e+37  ;;  %v1140_v4 = vor.u32 1.1754944e-38, %v1139_v35 }
 0x23e   :  { %v1469_v1 = vpop.eup %1468  ;;  %v876_v5 = vmul.f32 %v1467_v25, %v875_v30  ;;  %1472 = vpow2.f32 %v1402_v44  ;;  %v647_v8 = vadd.f32 %v1973_v39, %v646_v22  ;;  %v599_v54 = vadd.f32 %v1973_v39, %v598_v34 }
 0x23f   :  { %v866_v29 = vsel %vm865_vm0, %v1461_v16, %v862_v2  ;;  %v1129_v48 = vmul.f32 %v1469_v1, %v2137_v31  ;;  %vm1134_vm6 = vweird.f32 %v1469_v1  ;;  %v1117_v7 = vadd.f32 %v1465_v33, %v1116_v3 }
 0x240   :  { %v871_v6 = vsel %vm2141_vm8, %v870_v61, %v866_v29  ;;  %v877_v50 = vadd.f32 %v1467_v25, %v876_v5  ;;  %1474 = vpow2.f32 %v1386_v47  ;;  %v1471_v12 = vpop.eup %1470  ;;  %vm880_vm8 = vmor %vm878_vm12, %vm879_vm4  ;;  %v1403_v13 = vmul.f32 -1.442695, %v647_v8 }
 0x241   :  { %1283 = vst.msk [vmem:[%s2543_s4 + $0x20] sm:$0xff] %vm1278_vm3, %v871_v6  ;;  %v1130_v53 = vsub.f32 1.0, %v1129_v48  ;;  %v1121_v58 = vsel %vm1120_vm7, %v1465_v33, %v1117_v7  ;;  %v889_v14 = vmul.f32 %v1471_v12, %v2152_v36  ;;  %v897_v62 = vand.u32 2147483647, %v2152_v36  ;;  %vm1135_vm9 = vmor %vm1133_vm2, %vm1134_vm6 }
 0x242   :  { %v649_v52 = vpop.f32.mrf.mxu2  ;;  %v1126_v9 = vsel %vm2158_vm14, %v1125_v23, %v1121_v58  ;;  %v881_v59 = vsel %vm880_vm8, %v1467_v25, %v877_v50  ;;  %1476 = vpow2.f32 %v1403_v13  ;;  %v1387_v63 = vmul.f32 -1.442695, %v599_v54 }
 0x243   :  { %v650_v10 = vadd.f32 %v1973_v39, %v649_v52  ;;  %v1131_v11 = vmul.f32 %v1469_v1, %v1130_v53  ;;  %1300 = vst.msk [vmem:[%s2543_s4 + $0xa8] sm:$0xff] %vm1278_vm3, %v1126_v9  ;;  %v886_v57 = vsel %vm2164_vm15, %v885_v28, %v881_v59  ;;  %v890_v15 = vsub.f32 1.0, %v889_v14 }
 0x244   :  { %v601_v55 = vpop.f32.mrf.mxu1  ;;  %1284 = vst.msk [vmem:[%s2543_s4 + $0x28] sm:$0xff] %vm1278_vm3, %v886_v57  ;;  %v1473_v17 = vpop.eup %1472  ;;  %vm894_vm10 = vweird.f32 %v1471_v12  ;;  %v899_v19 = vand.u32 2147483648, %v2152_v36  ;;  %1478 = vpow2.f32 %v1387_v63  ;;  %vm893_vm11 = vweird.f32 %v2152_v36 }
 0x245   :  { %v602_v60 = vadd.f32 %v1973_v39, %v601_v55  ;;  %v1132_v16 = vadd.f32 %v1469_v1, %v1131_v11  ;;  %v1404_v18 = vmul.f32 -1.442695, %v650_v10  ;;  %v891_v56 = vmul.f32 %v1471_v12, %v890_v15  ;;  %vm895_vm12 = vmor %vm893_vm11, %vm894_vm10 }
 0x246   :  { %v1475_v20 = vpop.eup %1474  ;;  %v2221_v22 = vadd.f32 1.0, %v1473_v17  ;;  %v900_v23 = vor.u32 1.1754944e-38, %v899_v19  ;;  %vm898_vm13 = vcmp.eq.f32.partialorder %v897_v62, 8.507059e+37 }
 0x247   :  { %v1388_v40 = vmul.f32 -1.442695, %v602_v60  ;;  %v1136_v46 = vsel %vm1135_vm9, %v1469_v1, %v1132_v16  ;;  %1480 = vpow2.f32 %v1404_v18  ;;  %v2227_v31 = vadd.f32 1.0, %v1475_v20 }
 0x248   :  { %v1141_v51 = vsel %vm2181_vm5, %v1140_v4, %v1136_v46  ;;  %v892_v0 = vadd.f32 %v1471_v12, %v891_v56  ;;  %v1477_v24 = vpop.eup %1476  ;;  %v1152_v38 = vand.u32 2147483647, %v2221_v22  ;;  %v1154_v36 = vand.u32 2147483648, %v2221_v22 }
 0x249   :  { %1301 = vst.msk [vmem:[%s2543_s4 + $0xb0] sm:$0xff] %vm1278_vm3, %v1141_v51  ;;  %1482 = vpow2.f32 %v1388_v40  ;;  %v2234_v25 = vadd.f32 1.0, %v1477_v24  ;;  %v912_v41 = vand.u32 2147483647, %v2227_v31  ;;  %v914_v43 = vand.u32 2147483648, %v2227_v31 }
 0x24a   :  { %v652_v21 = vpop.f32.mrf.mxu2  ;;  %1484 = vrcp.f32 %v2221_v22  ;;  %v896_v34 = vsel %vm895_vm12, %v1471_v12, %v892_v0  ;;  %v1479_v37 = vpop.eup %1478  ;;  %vm1148_vm14 = vweird.f32 %v2221_v22  ;;  %vm908_vm15 = vweird.f32 %v2227_v31 }
 0x24b   :  { %v653_v61 = vadd.f32 %v1973_v39, %v652_v21  ;;  %1486 = vrcp.f32 %v2227_v31  ;;  %v901_v26 = vsel %vm898_vm13, %v900_v23, %v896_v34  ;;  %v2245_v35 = vadd.f32 1.0, %v1479_v37 }
 0x24c   :  { %v604_v33 = vpop.f32.mrf.mxu1  ;;  %1285 = vst.msk [vmem:[%s2543_s4 + $0x30] sm:$0xff] %vm1278_vm3, %v901_v26  ;;  %1488 = vrcp.f32 %v2234_v25  ;;  %vm2254_vm0 = vcmp.eq.f32.partialorder %v1152_v38, 8.507059e+37  ;;  %v1167_v47 = vand.u32 2147483647, %v2234_v25  ;;  %v1169_v29 = vand.u32 2147483648, %v2234_v25 }
 0x24d   :  { %v1405_v28 = vmul.f32 -1.442695, %v653_v61  ;;  %v1481_v27 = vpop.eup %1480  ;;  %v1155_v3 = vor.u32 1.1754944e-38, %v1154_v36  ;;  %vm2262_vm1 = vcmp.eq.f32.partialorder %v912_v41, 8.507059e+37  ;;  %v915_v52 = vor.u32 1.1754944e-38, %v914_v43 }
 0x24e   :  { %v2247_v44 = vadd.f32 1.0, %v1481_v27  ;;  %vm1163_vm2 = vweird.f32 %v2234_v25  ;;  %v927_v8 = vand.u32 2147483647, %v2245_v35  ;;  %v929_v50 = vand.u32 2147483648, %v2245_v35 }
 0x24f   :  { %v1483_v42 = vpop.eup %1482  ;;  %1490 = vpow2.f32 %v1405_v28  ;;  %v605_v54 = vadd.f32 %v1973_v39, %v604_v33  ;;  %vm2276_vm5 = vcmp.eq.f32.partialorder %v1167_v47, 8.507059e+37  ;;  %v1170_v58 = vor.u32 1.1754944e-38, %v1169_v29 }
 0x250   :  { %v1485_v32 = vpop.eup %1484  ;;  %1492 = vrcp.f32 %v2245_v35  ;;  %v2266_v6 = vadd.f32 1.0, %v1483_v42  ;;  %v1182_v60 = vand.u32 2147483647, %v2247_v44  ;;  %vm923_vm7 = vweird.f32 %v2245_v35 }
 0x251   :  { %v1487_v45 = vpop.eup %1486  ;;  %v1144_v1 = vmul.f32 %v1485_v32, %v2221_v22  ;;  %1494 = vrcp.f32 %v2247_v44  ;;  %vm1149_vm4 = vweird.f32 %v1485_v32  ;;  %v1184_v62 = vand.u32 2147483648, %v2247_v44 }
 0x252   :  { %v2251_v2 = vpop.f32.mrf.mxu2  ;;  %v904_v48 = vmul.f32 %v1487_v45, %v2227_v31  ;;  %v1489_v7 = vpop.eup %1488  ;;  %vm909_vm6 = vweird.f32 %v1487_v45  ;;  %1496 = vrcp.f32 %v2266_v6  ;;  %vm1150_vm8 = vmor %vm1148_vm14, %vm1149_vm4  ;;  %vm2287_vm10 = vcmp.eq.f32.partialorder %v927_v8, 8.507059e+37 }
 0x253   :  { %v1145_v4 = vsub.f32 1.0, %v1144_v1  ;;  %v1159_v55 = vmul.f32 %v1489_v7, %v2234_v25  ;;  %vm1164_vm9 = vweird.f32 %v1489_v7  ;;  %v930_v15 = vor.u32 1.1754944e-38, %v929_v50  ;;  %vm910_vm12 = vmor %vm908_vm15, %vm909_vm6 }
 0x254   :  { %v2268_v5 = vpop.f32.mrf.mxu1  ;;  %v905_v53 = vsub.f32 1.0, %v904_v48  ;;  %vm1178_vm11 = vweird.f32 %v2247_v44  ;;  %v942_v19 = vand.u32 2147483647, %v2266_v6  ;;  %vm2301_vm13 = vcmp.eq.f32.partialorder %v1182_v60, 8.507059e+37  ;;  %vm1165_vm14 = vmor %vm1163_vm2, %vm1164_vm9 }
 0x255   :  { %v1146_v10 = vmul.f32 %v1485_v32, %v1145_v4  ;;  %v1491_v11 = vpop.eup %1490  ;;  %v1160_v14 = vsub.f32 1.0, %v1159_v55  ;;  %v1185_v24 = vor.u32 1.1754944e-38, %v1184_v62  ;;  %v944_v23 = vand.u32 2147483648, %v2266_v6 }
 0x256   :  { %v906_v13 = vmul.f32 %v1487_v45, %v905_v53  ;;  %v1493_v9 = vpop.eup %1492  ;;  %v2296_v20 = vadd.f32 1.0, %v1491_v11  ;;  %v608_v47 = vadd.f32 %v1973_v39, %v2268_v5 }
 0x257   :  { %v1147_v59 = vadd.f32 %v1485_v32, %v1146_v10  ;;  %v919_v16 = vmul.f32 %v1493_v9, %v2245_v35  ;;  %v1495_v40 = vpop.eup %1494  ;;  %v1161_v46 = vmul.f32 %v1489_v7, %v1160_v14  ;;  %vm924_vm15 = vweird.f32 %v1493_v9 }
 0x258   :  { %v907_v57 = vadd.f32 %v1487_v45, %v906_v13  ;;  %v1174_v21 = vmul.f32 %v1495_v40, %v2247_v44  ;;  %v1497_v34 = vpop.eup %1496  ;;  %1498 = vrcp.f32 %v2296_v20  ;;  %vm1179_vm2 = vweird.f32 %v1495_v40  ;;  %vm925_vm4 = vmor %vm923_vm7, %vm924_vm15 }
 0x259   :  { %v1151_v17 = vsel %vm1150_vm8, %v1485_v32, %v1147_v59  ;;  %v920_v22 = vsub.f32 1.0, %v919_v16  ;;  %v1162_v33 = vadd.f32 %v1489_v7, %v1161_v46  ;;  %v934_v28 = vmul.f32 %v1497_v34, %v2266_v6  ;;  %vm1180_vm6 = vmor %vm1178_vm11, %vm1179_vm2 }
 0x25a   :  { %v658_v18 = vpop.f32.mrf.mxu2  ;;  %v1156_v51 = vsel %vm2254_vm0, %v1155_v3, %v1151_v17  ;;  %v911_v56 = vsel %vm910_vm12, %v1487_v45, %v907_v57  ;;  %v1175_v26 = vsub.f32 1.0, %v1174_v21  ;;  %vm938_vm0 = vweird.f32 %v2266_v6 }
 0x25b   :  { %1302 = vst.msk [vmem:[%s2543_s4 + $0xb8] sm:$0xff] %vm1278_vm3, %v1156_v51  ;;  %v916_v31 = vsel %vm2262_vm1, %v915_v52, %v911_v56  ;;  %v921_v37 = vmul.f32 %v1493_v9, %v920_v22  ;;  %v1166_v38 = vsel %vm1165_vm14, %v1489_v7, %v1162_v33  ;;  %vm2322_vm1 = vcmp.eq.f32.partialorder %v942_v19, 8.507059e+37 }
 0x25c   :  { %v610_v0 = vpop.f32.mrf.mxu1  ;;  %1286 = vst.msk [vmem:[%s2543_s4 + $0x38] sm:$0xff] %vm1278_vm3, %v916_v31  ;;  %v1171_v36 = vsel %vm2276_vm5, %v1170_v58, %v1166_v38  ;;  %v1176_v25 = vmul.f32 %v1495_v40, %v1175_v26  ;;  %v935_v42 = vsub.f32 1.0, %v934_v28  ;;  %v945_v43 = vor.u32 1.1754944e-38, %v944_v23  ;;  %v2397_v28 = vld [vmem:[#allocation2] ss:$0 sm:$0xff] }
 0x25d   :  { %v922_v41 = vadd.f32 %v1493_v9, %v921_v37  ;;  %1303 = vst.msk [vmem:[%s2543_s4 + $0xc0] sm:$0xff] %vm1278_vm3, %v1171_v36  ;;  %v1389_v32 = vmul.f32 -1.442695, %v605_v54  ;;  %v656_v45 = vadd.f32 %v1973_v39, %v2251_v2  ;;  %vm939_vm5 = vweird.f32 %v1497_v34 }
 0x25e   :  { %v1177_v30 = vadd.f32 %v1495_v40, %v1176_v25  ;;  %v936_v35 = vmul.f32 %v1497_v34, %v935_v42  ;;  %v1499_v49 = vpop.eup %1498  ;;  %v1390_v4 = vmul.f32 -1.442695, %v608_v47  ;;  %v659_v5 = vadd.f32 %v1973_v39, %v658_v18  ;;  %vm940_vm7 = vmor %vm938_vm0, %vm939_vm5 }
 0x25f   :  { %v926_v1 = vsel %vm925_vm4, %v1493_v9, %v922_v41  ;;  %1500 = vpow2.f32 %v1389_v32  ;;  %v1406_v48 = vmul.f32 -1.442695, %v656_v45  ;;  %v611_v52 = vadd.f32 %v1973_v39, %v610_v0 }
 0x260   :  { %v931_v3 = vsel %vm2287_vm10, %v930_v15, %v926_v1  ;;  %v1181_v2 = vsel %vm1180_vm6, %v1495_v40, %v1177_v30  ;;  %v937_v53 = vadd.f32 %v1497_v34, %v936_v35  ;;  %v1189_v8 = vmul.f32 %v1499_v49, %v2296_v20 }
 0x261   :  { %1287 = vst.msk [vmem:[%s2543_s4 + $0x40] sm:$0xff] %vm1278_vm3, %v931_v3  ;;  %v1186_v44 = vsel %vm2301_vm13, %v1185_v24, %v1181_v2  ;;  %v1197_v50 = vand.u32 2147483647, %v2296_v20  ;;  %1502 = vpow2.f32 %v1406_v48  ;;  %v1407_v54 = vmul.f32 -1.442695, %v659_v5 }
 0x262   :  { %v661_v29 = vpop.f32.mrf.mxu2  ;;  %1304 = vst.msk [vmem:[%s2543_s4 + $0xc8] sm:$0xff] %vm1278_vm3, %v1186_v44  ;;  %v1391_v10 = vmul.f32 -1.442695, %v611_v52  ;;  %v941_v12 = vsel %vm940_vm7, %v1497_v34, %v937_v53  ;;  %v1190_v58 = vsub.f32 1.0, %v1189_v8  ;;  %1504 = vpow2.f32 %v1390_v4 }
 0x263   :  { %v662_v55 = vadd.f32 %v1973_v39, %v661_v29  ;;  %v946_v13 = vsel %vm2322_vm1, %v945_v43, %v941_v12  ;;  %v1199_v60 = vand.u32 2147483648, %v2296_v20  ;;  %1506 = vpow2.f32 %v1407_v54 }
 0x264   :  { %v613_v7 = vpop.f32.mrf.mxu1  ;;  %1288 = vst.msk [vmem:[%s2543_s4 + $0x48] sm:$0xff] %vm1278_vm3, %v946_v13  ;;  %v1191_v6 = vmul.f32 %v1499_v49, %v1190_v58  ;;  %vm1194_vm8 = vweird.f32 %v1499_v49  ;;  %1508 = vpow2.f32 %v1391_v10  ;;  %vm1193_vm9 = vweird.f32 %v2296_v20 }
 0x265   :  { %v614_v11 = vadd.f32 %v1973_v39, %v613_v7  ;;  %v1408_v9 = vmul.f32 -1.442695, %v662_v55  ;;  %v1501_v59 = vpop.eup %1500  ;;  %vm1195_vm10 = vmor %vm1193_vm9, %vm1194_vm8  ;;  %v1200_v15 = vor.u32 1.1754944e-38, %v1199_v60  ;;  %vm1198_vm11 = vcmp.eq.f32.partialorder %v1197_v50, 8.507059e+37 }
 0x266   :  { %v2368_v62 = vadd.f32 1.0, %v1501_v59  ;;  %v1192_v16 = vadd.f32 %v1499_v49, %v1191_v6 }
 0x267   :  { %v1392_v14 = vmul.f32 -1.442695, %v614_v11  ;;  %1510 = vpow2.f32 %v1408_v9  ;;  %v1503_v63 = vpop.eup %1502 }
 0x268   :  { %v1505_v18 = vpop.eup %1504  ;;  %v1196_v40 = vsel %vm1195_vm10, %v1499_v49, %v1192_v16  ;;  %v2372_v17 = vadd.f32 1.0, %v1503_v63  ;;  %v957_v20 = vand.u32 2147483647, %v2368_v62  ;;  %v959_v0 = vand.u32 2147483648, %v2368_v62 }
 0x269   :  { %1512 = vpow2.f32 %v1392_v14  ;;  %v1507_v19 = vpop.eup %1506  ;;  %v1201_v51 = vsel %vm1198_vm11, %v1200_v15, %v1196_v40  ;;  %v2375_v56 = vadd.f32 1.0, %v1505_v18  ;;  %vm953_vm12 = vweird.f32 %v2368_v62 }
 0x26a   :  { %v664_v57 = vpop.f32.mrf.mxu2  ;;  %1514 = vrcp.f32 %v2368_v62  ;;  %v1509_v22 = vpop.eup %1508  ;;  %1305 = vst.msk [vmem:[%s2543_s4 + $0xd0] sm:$0xff] %vm1278_vm3, %v1201_v51  ;;  %v1214_v31 = vand.u32 2147483648, %v2372_v17  ;;  %v2387_v33 = vadd.f32 1.0, %v1507_v19  ;;  %v1212_v37 = vand.u32 2147483647, %v2372_v17 }
 0x26b   :  { %v665_v46 = vadd.f32 %v1973_v39, %v664_v57  ;;  %1516 = vrcp.f32 %v2372_v17  ;;  %v2389_v24 = vadd.f32 1.0, %v1509_v22  ;;  %v974_v26 = vand.u32 2147483648, %v2375_v56 }
 0x26c   :  { %v616_v21 = vpop.f32.mrf.mxu1  ;;  %1518 = vrcp.f32 %v2375_v56  ;;  %vm2403_vm13 = vcmp.eq.f32.partialorder %v957_v20, 8.507059e+37  ;;  %v972_v25 = vand.u32 2147483647, %v2375_v56  ;;  %v960_v42 = vor.u32 1.1754944e-38, %v959_v0 }
 0x26d   :  { %v1511_v61 = vpop.eup %1510  ;;  %v2391_v23 = vmul.f32 -1.442695, %v665_v46  ;;  %v2400_v27 = vadd.f32 %v2397_v28, %v616_v21  ;;  %1520 = vrcp.f32 %v2387_v33  ;;  %vm1208_vm14 = vweird.f32 %v2372_v17 }
 0x26e   :  { %v2395_v38 = vadd.f32 1.0, %v1511_v61  ;;  %v1229_v43 = vand.u32 2147483648, %v2387_v33  ;;  %1522 = vrcp.f32 %v2389_v24  ;;  %v1215_v1 = vor.u32 1.1754944e-38, %v1214_v31 }
 0x26f   :  { %v1513_v39 = vpop.eup %1512  ;;  %vm968_vm15 = vweird.f32 %v2375_v56  ;;  %vm2417_vm0 = vcmp.eq.f32.partialorder %v1212_v37, 8.507059e+37  ;;  %v975_v35 = vor.u32 1.1754944e-38, %v974_v26  ;;  %v1227_v48 = vand.u32 2147483647, %v2387_v33 }
 0x270   :  { %v1515_v34 = vpop.eup %1514  ;;  %1524 = vrcp.f32 %v2395_v38  ;;  %v2414_v30 = vadd.f32 1.0, %v1513_v39  ;;  %v989_v49 = vand.u32 2147483648, %v2389_v24  ;;  %vm2424_vm2 = vcmp.eq.f32.partialorder %v972_v25, 8.507059e+37 }
 0x271   :  { %v949_v36 = vmul.f32 %v1515_v34, %v2368_v62  ;;  %v1517_v32 = vpop.eup %1516  ;;  %vm954_vm1 = vweird.f32 %v1515_v34  ;;  %v987_v52 = vand.u32 2147483647, %v2389_v24  ;;  %vm1223_vm6 = vweird.f32 %v2387_v33 }
 0x272   :  { %v1519_v47 = vpop.eup %1518  ;;  %v1204_v29 = vmul.f32 %v1517_v32, %v2372_v17  ;;  %vm1209_vm4 = vweird.f32 %v1517_v32  ;;  %v1230_v44 = vor.u32 1.1754944e-38, %v1229_v43  ;;  %vm983_vm7 = vweird.f32 %v2389_v24  ;;  %vm955_vm8 = vmor %vm953_vm12, %vm954_vm1  ;;  %v667_v26 = vpop.f32.mrf.mxu2 }
 0x273   :  { %v950_v45 = vsub.f32 1.0, %v949_v36  ;;  %v964_v4 = vmul.f32 %v1519_v47, %v2375_v56  ;;  %vm969_vm5 = vweird.f32 %v1519_v47  ;;  %v1521_v53 = vpop.eup %1520  ;;  %v1242_v54 = vand.u32 2147483647, %v2395_v38  ;;  %vm1210_vm12 = vmor %vm1208_vm14, %vm1209_vm4 }
 0x274   :  { %v1205_v7 = vsub.f32 1.0, %v1204_v29  ;;  %1526 = vrcp.f32 %v2414_v30  ;;  %v1523_v10 = vpop.eup %1522  ;;  %v1219_v12 = vmul.f32 %v1521_v53, %v2387_v33  ;;  %vm2437_vm9 = vcmp.eq.f32.partialorder %v1227_v48, 8.507059e+37 }
 0x275   :  { %v951_v2 = vmul.f32 %v1515_v34, %v950_v45  ;;  %v965_v50 = vsub.f32 1.0, %v964_v4  ;;  %v990_v11 = vor.u32 1.1754944e-38, %v989_v49  ;;  %v979_v59 = vmul.f32 %v1523_v10, %v2389_v24 }
 0x276   :  { %v1206_v55 = vmul.f32 %v1517_v32, %v1205_v7  ;;  %v1525_v13 = vpop.eup %1524  ;;  %vm2443_vm11 = vcmp.eq.f32.partialorder %v987_v52, 8.507059e+37  ;;  %v1244_v14 = vand.u32 2147483648, %v2395_v38  ;;  %v1220_v16 = vsub.f32 1.0, %v1219_v12 }
 0x277   :  { %v952_v8 = vadd.f32 %v1515_v34, %v951_v2  ;;  %v966_v9 = vmul.f32 %v1519_v47, %v965_v50  ;;  %v1234_v63 = vmul.f32 %v1525_v13, %v2395_v38  ;;  %vm1224_vm1 = vweird.f32 %v1521_v53 }
 0x278   :  { %v1207_v57 = vadd.f32 %v1517_v32, %v1206_v55  ;;  %v980_v18 = vsub.f32 1.0, %v979_v59  ;;  %v1221_v19 = vmul.f32 %v1521_v53, %v1220_v16  ;;  %vm984_vm10 = vweird.f32 %v1523_v10 }
 0x279   :  { %v956_v60 = vsel %vm955_vm8, %v1515_v34, %v952_v8  ;;  %v967_v15 = vadd.f32 %v1519_v47, %v966_v9  ;;  %vm2458_vm8 = vcmp.eq.f32.partialorder %v1242_v54, 8.507059e+37  ;;  %v1235_v51 = vsub.f32 1.0, %v1234_v63 }
 0x27a   :  { %v961_v62 = vsel %vm2403_vm13, %v960_v42, %v956_v60  ;;  %v1211_v46 = vsel %vm1210_vm12, %v1517_v32, %v1207_v57  ;;  %vm970_vm13 = vmor %vm968_vm15, %vm969_vm5  ;;  %v1527_v22 = vpop.eup %1526  ;;  %v981_v21 = vmul.f32 %v1523_v10, %v980_v18  ;;  %vm1239_vm14 = vweird.f32 %v1525_v13  ;;  %v619_v42 = vpop.f32.mrf.mxu1 }
 0x27b   :  { %1289 = vst.msk [vmem:[%s2543_s4 + $0x50] sm:$0xff] %vm1278_vm3, %v961_v62  ;;  %v1216_v17 = vsel %vm2417_vm0, %v1215_v1, %v1211_v46  ;;  %v971_v20 = vsel %vm970_vm13, %v1519_v47, %v967_v15  ;;  %v1222_v56 = vadd.f32 %v1521_v53, %v1221_v19  ;;  %v1236_v0 = vmul.f32 %v1525_v13, %v1235_v51  ;;  %vm1225_vm15 = vmor %vm1223_vm6, %vm1224_vm1 }
 0x27c   :  { %1306 = vst.msk [vmem:[%s2543_s4 + $0xd8] sm:$0xff] %vm1278_vm3, %v1216_v17  ;;  %v976_v61 = vsel %vm2424_vm2, %v975_v35, %v971_v20  ;;  %v994_v39 = vmul.f32 %v1527_v22, %v2414_v30  ;;  %v982_v31 = vadd.f32 %v1523_v10, %v981_v21  ;;  %v1245_v34 = vor.u32 1.1754944e-38, %v1244_v14  ;;  %vm985_vm2 = vmor %vm983_vm7, %vm984_vm10 }
 0x27d   :  { %1290 = vst.msk [vmem:[%s2543_s4 + $0x58] sm:$0xff] %vm1278_vm3, %v976_v61  ;;  %vm999_vm0 = vweird.f32 %v1527_v22  ;;  %v1002_v37 = vand.u32 2147483647, %v2414_v30  ;;  %v1226_v36 = vsel %vm1225_vm15, %v1521_v53, %v1222_v56  ;;  %v1237_v41 = vadd.f32 %v1525_v13, %v1236_v0 }
 0x27e   :  { %v995_v25 = vsub.f32 1.0, %v994_v39  ;;  %1528 = vpow2.f32 %v2391_v23  ;;  %v1231_v33 = vsel %vm2437_vm9, %v1230_v44, %v1226_v36  ;;  %v986_v43 = vsel %vm985_vm2, %v1523_v10, %v982_v31 }
 0x27f   :  { %vm2588_vm4 = vweird.f32 %v2395_v38  ;;  %v1004_v32 = vand.u32 2147483648, %v2414_v30  ;;  %v1393_v45 = vmul.f32 -1.442695, %v2400_v27  ;;  %1307 = vst.msk [vmem:[%s2543_s4 + $0xe0] sm:$0xff] %vm1278_vm3, %v1231_v33  ;;  %v991_v24 = vsel %vm2443_vm11, %v990_v11, %v986_v43 }
 0x280   :  { %vm1240_vm5 = vmor %vm2588_vm4, %vm1239_vm14  ;;  %v996_v1 = vmul.f32 %v1527_v22, %v995_v25  ;;  %v668_v47 = vadd.f32 %v2397_v28, %v667_v26  ;;  %1291 = vst.msk [vmem:[%s2543_s4 + $0x60] sm:$0xff] %vm1278_vm3, %v991_v24  ;;  %v620_v27 = vadd.f32 %v2397_v28, %v619_v42  ;;  %vm998_vm6 = vweird.f32 %v2414_v30 }
 0x281   :  { %v1241_v23 = vsel %vm1240_vm5, %v1525_v13, %v1237_v41  ;;  %1530 = vpow2.f32 %v1393_v45  ;;  %vm1000_vm7 = vmor %vm998_vm6, %vm999_vm0  ;;  %v1005_v35 = vor.u32 1.1754944e-38, %v1004_v32  ;;  %vm1003_vm9 = vcmp.eq.f32.partialorder %v1002_v37, 8.507059e+37 }
 0x282   :  { %v1246_v38 = vsel %vm2458_vm8, %v1245_v34, %v1241_v23  ;;  %v997_v29 = vadd.f32 %v1527_v22, %v996_v1  ;;  %v1410_v3 = vmul.f32 -1.442695, %v668_v47  ;;  %v1394_v48 = vmul.f32 -1.442695, %v620_v27 }
 0x283   :  { %1308 = vst.msk [vmem:[%s2543_s4 + $0xe8] sm:$0xff] %vm1278_vm3, %v1246_v38 }
 0x284   :  { %v1529_v49 = vpop.eup %1528  ;;  %v1001_v2 = vsel %vm1000_vm7, %v1527_v22, %v997_v29  ;;  %1532 = vpow2.f32 %v1410_v3 }
 0x285   :  { %v1006_v4 = vsel %vm1003_vm9, %v1005_v35, %v1001_v2  ;;  %v796_v5 = vadd.f32 1.0, %v1529_v49  ;;  %1534 = vpow2.f32 %v1394_v48 }
 0x286   :  { %1292 = vst.msk [vmem:[%s2543_s4 + $0x68] sm:$0xff] %vm1278_vm3, %v1006_v4 }
 0x287   :  { %v1531_v28 = vpop.eup %1530  ;;  %1536 = vrcp.f32 %v796_v5  ;;  %v1257_v55 = vand.u32 2147483647, %v796_v5  ;;  %v1259_v12 = vand.u32 2147483648, %v796_v5  ;;  %vm1253_vm11 = vweird.f32 %v796_v5 }
 0x288   :  { %v780_v30 = vadd.f32 1.0, %v1531_v28 }
 0x289   :  { %vm1258_vm12 = vcmp.eq.f32.partialorder %v1257_v55, 8.507059e+37  ;;  %v1260_v62 = vor.u32 1.1754944e-38, %v1259_v12 }
 0x28a   :  { %v1533_v52 = vpop.eup %1532  ;;  %1538 = vrcp.f32 %v780_v30  ;;  %v1017_v13 = vand.u32 2147483647, %v780_v30  ;;  %v1019_v60 = vand.u32 2147483648, %v780_v30  ;;  %vm1013_vm8 = vweird.f32 %v780_v30 }
 0x28b   :  { %v1535_v7 = vpop.eup %1534  ;;  %v797_v44 = vadd.f32 1.0, %v1533_v52 }
 0x28c   :  { %v781_v53 = vadd.f32 1.0, %v1535_v7  ;;  %vm2517_vm14 = vcmp.eq.f32.partialorder %v1017_v13, 8.507059e+37  ;;  %v1020_v40 = vor.u32 1.1754944e-38, %v1019_v60 }
 0x28d   :  { %v1537_v8 = vpop.eup %1536  ;;  %1540 = vrcp.f32 %v797_v44  ;;  %v1274_v22 = vand.u32 2147483648, %v797_v44  ;;  %v1272_v21 = vand.u32 2147483647, %v797_v44  ;;  %vm1268_vm4 = vweird.f32 %v797_v44 }
 0x28e   :  { %v1249_v50 = vmul.f32 %v1537_v8, %v796_v5  ;;  %1542 = vrcp.f32 %v781_v53  ;;  %vm1254_vm10 = vweird.f32 %v1537_v8  ;;  %v1034_v61 = vand.u32 2147483648, %v781_v53 }
 0x28f   :  { %vm1255_vm1 = vmor %vm1253_vm11, %vm1254_vm10  ;;  %v1032_v39 = vand.u32 2147483647, %v781_v53  ;;  %v1275_v37 = vor.u32 1.1754944e-38, %v1274_v22  ;;  %vm1028_vm6 = vweird.f32 %v781_v53  ;;  %vm1273_vm7 = vcmp.eq.f32.partialorder %v1272_v21, 8.507059e+37 }
 0x290   :  { %v1539_v54 = vpop.eup %1538  ;;  %v1250_v10 = vsub.f32 1.0, %v1249_v50  ;;  %v1035_v41 = vor.u32 1.1754944e-38, %v1034_v61 }
 0x291   :  { %v1009_v58 = vmul.f32 %v1539_v54, %v780_v30  ;;  %vm1014_vm13 = vweird.f32 %v1539_v54  ;;  %vm1033_vm10 = vcmp.eq.f32.partialorder %v1032_v39, 8.507059e+37 }
 0x292   :  { %v1251_v11 = vmul.f32 %v1537_v8, %v1250_v10  ;;  %vm1015_vm15 = vmor %vm1013_vm8, %vm1014_vm13 }
 0x293   :  { %v1541_v9 = vpop.eup %1540  ;;  %v1010_v59 = vsub.f32 1.0, %v1009_v58 }
 0x294   :  { %v1543_v6 = vpop.eup %1542  ;;  %v1252_v14 = vadd.f32 %v1537_v8, %v1251_v11  ;;  %v1264_v57 = vmul.f32 %v1541_v9, %v797_v44  ;;  %vm1269_vm0 = vweird.f32 %v1541_v9 }
 0x295   :  { %v1011_v16 = vmul.f32 %v1539_v54, %v1010_v59  ;;  %v1024_v63 = vmul.f32 %v1543_v6, %v781_v53  ;;  %vm1029_vm2 = vweird.f32 %v1543_v6  ;;  %vm1270_vm5 = vmor %vm1268_vm4, %vm1269_vm0 }
 0x296   :  { %v1256_v15 = vsel %vm1255_vm1, %v1537_v8, %v1252_v14  ;;  %v1265_v46 = vsub.f32 1.0, %v1264_v57  ;;  %vm1030_vm9 = vmor %vm1028_vm6, %vm1029_vm2 }
 0x297   :  { %v1261_v19 = vsel %vm1258_vm12, %v1260_v62, %v1256_v15  ;;  %v1012_v51 = vadd.f32 %v1539_v54, %v1011_v16  ;;  %v1025_v17 = vsub.f32 1.0, %v1024_v63 }
 0x298   :  { %1309 = vst.msk [vmem:[%s2543_s4 + $0xf0] sm:$0xff] %vm1278_vm3, %v1261_v19  ;;  %v1266_v20 = vmul.f32 %v1541_v9, %v1265_v46 }
 0x299   :  { %v1016_v56 = vsel %vm1015_vm15, %v1539_v54, %v1012_v51  ;;  %v1026_v0 = vmul.f32 %v1543_v6, %v1025_v17 }
 0x29a   :  { %v1021_v31 = vsel %vm2517_vm14, %v1020_v40, %v1016_v56  ;;  %v1267_v34 = vadd.f32 %v1541_v9, %v1266_v20 }
 0x29b   :  { %1293 = vst.msk [vmem:[%s2543_s4 + $0x70] sm:$0xff] %vm1278_vm3, %v1021_v31  ;;  %v1027_v26 = vadd.f32 %v1543_v6, %v1026_v0 }
 0x29c   :  { %v1271_v36 = vsel %vm1270_vm5, %v1541_v9, %v1267_v34 }
 0x29d   :  { %v1276_v25 = vsel %vm1273_vm7, %v1275_v37, %v1271_v36  ;;  %v1031_v42 = vsel %vm1030_vm9, %v1543_v6, %v1027_v26 }
 0x29e   :  { %1310 = vst.msk [vmem:[%s2543_s4 + $0xf8] sm:$0xff] %vm1278_vm3, %v1276_v25  ;;  %v1036_v33 = vsel %vm1033_vm10, %v1035_v41, %v1031_v42 }
 0x29f   :  { %1294 = vst.msk [vmem:[%s2543_s4 + $0x78] sm:$0xff] %vm1278_vm3, %v1036_v33 }

</bundles_post_ra>
